<compile_context>
chip_gen: v7x
topology: tpu7x:2x2x1
jax: 0.10.0
libtpu: 0.0.40
codegen_flags: <defaults>
</compile_context>

<pallas_src>
import jax
import jax.numpy as jnp
from jax.experimental import pallas as pl
from jax.experimental.pallas import tpu as pltpu

EPS = 1e-5
LANE = 128                      # channel / K axes are zero-padded to multiples of the lane width
MATMUL_DTYPE = jnp.bfloat16     # MXU operand dtype (accumulation is always f32)


# ---------------------------------------------------------------------------
# Pallas kernels (all tiled over rows of the im2col matrix)
# ---------------------------------------------------------------------------
def conv_stats_kernel(p_ref, w_ref, sum_ref, sq_ref):
    """Raw conv output for this row-tile -> per-channel partial sum / sum-of-squares."""
    y = jnp.dot(p_ref[...], w_ref[...], preferred_element_type=jnp.float32)
    sum_ref[0] = jnp.sum(y, axis=0, keepdims=True)
    sq_ref[0] = jnp.sum(y * y, axis=0, keepdims=True)


def conv_affine_relu_kernel(p_ref, w_ref, shift_ref, o_ref):
    """relu(p @ w_scaled + shift): conv with BatchNorm folded into weights/shift, + ReLU."""
    y = jnp.dot(p_ref[...], w_ref[...], preferred_element_type=jnp.float32)
    o_ref[...] = jnp.maximum(y + shift_ref[...], 0.0).astype(o_ref.dtype)


def conv_affine_add_relu_kernel(p_ref, w_ref, shift_ref, res_ref, o_ref):
    """relu(p @ w_scaled + shift + residual): conv + folded BN + identity shortcut + ReLU."""
    y = jnp.dot(p_ref[...], w_ref[...], preferred_element_type=jnp.float32)
    y = y + shift_ref[...] + res_ref[...].astype(jnp.float32)
    o_ref[...] = jnp.maximum(y, 0.0).astype(o_ref.dtype)


def _compiler_params():
    # 32 MiB scoped VMEM is safe on v5e/v6e (128 MiB) and v7x (64 MiB physical);
    # "parallel" lets the two TensorCores of a v7x chip split the M grid.
    return pltpu.CompilerParams(
        dimension_semantics=("parallel",),
        vmem_limit_bytes=32 * 1024 * 1024,
    )


def conv_batch_stats(p, w, tile_m):
    """Per-channel (sum, sum_sq) of p @ w over all rows (zero-padded rows contribute 0)."""
    m_pad, k = p.shape
    cp = w.shape[1]
    g = m_pad // tile_m
    sums, sqs = pl.pallas_call(
        conv_stats_kernel,
        out_shape=(jax.ShapeDtypeStruct((g, 1, cp), jnp.float32),
                   jax.ShapeDtypeStruct((g, 1, cp), jnp.float32)),
        grid=(g,),
        in_specs=[pl.BlockSpec((tile_m, k), lambda i: (i, 0)),
                  pl.BlockSpec((k, cp), lambda i: (0, 0))],          # weights stay resident
        out_specs=(pl.BlockSpec((1, 1, cp), lambda i: (i, 0, 0)),
                   pl.BlockSpec((1, 1, cp), lambda i: (i, 0, 0))),
        compiler_params=_compiler_params(),
    )(p, w)
    return jnp.sum(sums, axis=(0, 1)), jnp.sum(sqs, axis=(0, 1))


def conv_affine_relu(p, w_scaled, shift, tile_m, out_dtype):
    m_pad, k = p.shape
    cp = w_scaled.shape[1]
    g = m_pad // tile_m
    return pl.pallas_call(
        conv_affine_relu_kernel,
        out_shape=jax.ShapeDtypeStruct((m_pad, cp), out_dtype),
        grid=(g,),
        in_specs=[pl.BlockSpec((tile_m, k), lambda i: (i, 0)),
                  pl.BlockSpec((k, cp), lambda i: (0, 0)),
                  pl.BlockSpec((1, cp), lambda i: (0, 0))],
        out_specs=pl.BlockSpec((tile_m, cp), lambda i: (i, 0)),
        compiler_params=_compiler_params(),
    )(p, w_scaled, shift)


def conv_affine_add_relu(p, w_scaled, shift, res, tile_m, out_dtype):
    m_pad, k = p.shape
    cp = w_scaled.shape[1]
    g = m_pad // tile_m
    return pl.pallas_call(
        conv_affine_add_relu_kernel,
        out_shape=jax.ShapeDtypeStruct((m_pad, cp), out_dtype),
        grid=(g,),
        in_specs=[pl.BlockSpec((tile_m, k), lambda i: (i, 0)),
                  pl.BlockSpec((k, cp), lambda i: (0, 0)),
                  pl.BlockSpec((1, cp), lambda i: (0, 0)),
                  pl.BlockSpec((tile_m, cp), lambda i: (i, 0))],
        out_specs=pl.BlockSpec((tile_m, cp), lambda i: (i, 0)),
        compiler_params=_compiler_params(),
    )(p, w_scaled, shift, res)


# ---------------------------------------------------------------------------
# Glue: padding / im2col / weight packing / BN fold (plain JAX, fused by XLA under jit)
# ---------------------------------------------------------------------------
def _round_up(n, m):
    return (n + m - 1) // m * m


def _pad2d(a, rows, cols):
    return jnp.pad(a, ((0, rows - a.shape[0]), (0, cols - a.shape[1])))


def _pad1d(a, n):
    return jnp.pad(a, (0, n - a.shape[0]))


def im2col(x_nhwc, ksize, stride, pad):
    """(N,H,W,C) -> (N*Ho*Wo, k*k*C) patches; column order (ki, kj, c)."""
    N, H, W, C = x_nhwc.shape
    xp = jnp.pad(x_nhwc, ((0, 0), (pad, pad), (pad, pad), (0, 0)))
    Ho = (H + 2 * pad - ksize) // stride + 1
    Wo = (W + 2 * pad - ksize) // stride + 1
    cols = []
    for ki in range(ksize):
        for kj in range(ksize):
            cols.append(xp[:, ki:ki + stride * Ho:stride, kj:kj + stride * Wo:stride, :])
    p = jnp.concatenate(cols, axis=-1)
    return p.reshape(N * Ho * Wo, ksize * ksize * C), (Ho, Wo)


def _w_to_mat(w_oihw, kpad, cout_pad):
    """(Cout,Cin,kh,kw) -> (kh*kw*Cin, Cout), zero-padded at the end to (kpad, cout_pad)."""
    cout = w_oihw.shape[0]
    wm = jnp.transpose(w_oihw, (2, 3, 1, 0)).reshape(-1, cout)
    return _pad2d(wm, kpad, cout_pad)


def _w_to_mat_cpad(w_oihw, cin_pad, cout_pad):
    """Same, but zero-pads Cin *per 3x3 tap* so rows align with channel-padded patches."""
    cout, cin, kh, kw = w_oihw.shape
    wm = jnp.transpose(w_oihw, (2, 3, 1, 0))                      # (kh, kw, cin, cout)
    wm = jnp.pad(wm, ((0, 0), (0, 0), (0, cin_pad - cin), (0, cout_pad - cout)))
    return wm.reshape(kh * kw * cin_pad, cout_pad)


def _fold_bn(ssum, ssq, count, gamma, beta):
    """Training-mode BatchNorm (biased variance) folded into per-channel scale/shift."""
    mean = ssum / count
    var = jnp.maximum(ssq / count - mean * mean, 0.0)
    scale = gamma * jax.lax.rsqrt(var + EPS)
    shift = beta - mean * scale
    return scale, shift


# ---------------------------------------------------------------------------
# ResidualBlock forward
# ---------------------------------------------------------------------------
def residual_block_forward(x_nchw, params, stride, tile_m=None):
    N, Cin, H, W = x_nchw.shape
    Cout = params["w1"].shape[0]
    cp = _round_up(Cout, LANE)                                    # lane-dense output channels

    x = jnp.transpose(x_nchw, (0, 2, 3, 1)).astype(jnp.float32)   # NHWC

    # ----- conv1 (3x3, stride, pad=1) + bn1 + relu -----
    p1, (Ho, Wo) = im2col(x, 3, stride, 1)
    M = p1.shape[0]
    if tile_m is None:
        tile_m = min(512, _round_up(M, 8))                        # large row tiles (VMEM budgeted)
    m_pad = _round_up(M, tile_m)

    k1 = _round_up(p1.shape[1], LANE)
    p1 = _pad2d(p1, m_pad, k1).astype(MATMUL_DTYPE)
    w1 = _w_to_mat(params["w1"], k1, cp)                          # f32, zero-padded
    g1, b1 = _pad1d(params["g1"], cp), _pad1d(params["b1"], cp)

    s1, q1 = conv_batch_stats(p1, w1.astype(MATMUL_DTYPE), tile_m)
    scale1, shift1 = _fold_bn(s1, q1, M, g1, b1)
    out1 = conv_affine_relu(p1, (w1 * scale1).astype(MATMUL_DTYPE),
                            shift1.reshape(1, -1), tile_m, MATMUL_DTYPE)

    # ----- conv2 (3x3, stride=1, pad=1) over the (channel-padded) out1 -----
    p2, _ = im2col(out1[:M].reshape(N, Ho, Wo, cp), 3, 1, 1)      # (M, 9*cp), lane-aligned
    p2 = jnp.pad(p2, ((0, m_pad - M), (0, 0)))
    w2 = _w_to_mat_cpad(params["w2"], cp, cp)                     # f32, (9*cp, cp)
    g2, b2 = _pad1d(params["g2"], cp), _pad1d(params["b2"], cp)
    s2, q2 = conv_batch_stats(p2, w2.astype(MATMUL_DTYPE), tile_m)
    scale2, shift2 = _fold_bn(s2, q2, M, g2, b2)

    if stride != 1 or Cin != Cout:
        # Projection shortcut: 1x1 conv stride s == strided spatial subsample of x.
        ks = _round_up(Cin, LANE)
        xs = x[:, ::stride, ::stride, :].reshape(M, Cin)
        xs = _pad2d(xs, m_pad, ks).astype(MATMUL_DTYPE)
        ws = _w_to_mat(params["ws"], ks, cp)
        gs, bs = _pad1d(params["gs"], cp), _pad1d(params["bs"], cp)
        ss, qs = conv_batch_stats(xs, ws.astype(MATMUL_DTYPE), tile_m)
        scales, shifts = _fold_bn(ss, qs, M, gs, bs)

        # Single fused MXU matmul: [p2 | xs] @ [scale2*w2 ; scales*ws] + (shift2+shifts), ReLU.
        pcat = jnp.concatenate([p2, xs], axis=1)
        wcat = jnp.concatenate([w2 * scale2, ws * scales], axis=0).astype(MATMUL_DTYPE)
        out = conv_affine_relu(pcat, wcat, (shift2 + shifts).reshape(1, -1),
                               tile_m, jnp.float32)
    else:
        # Identity shortcut: fused conv2 + bn2 + add(x) + relu.
        res = _pad2d(x.reshape(M, Cin), m_pad, cp)
        out = conv_affine_add_relu(p2, (w2 * scale2).astype(MATMUL_DTYPE),
                                   shift2.reshape(1, -1), res, tile_m, jnp.float32)

    out = out[:M, :Cout].reshape(N, Ho, Wo, Cout)
    return jnp.transpose(out, (0, 3, 1, 2))                       # back to NCHW


# ---------------------------------------------------------------------------
# Pure-JAX reference (mirrors the PyTorch forward in training mode, f32)
# ---------------------------------------------------------------------------
def ref_residual_block(x, params, stride):
    def conv(x, w, s, p):
        return jax.lax.conv_general_dilated(
            x, w, (s, s), ((p, p), (p, p)),
            dimension_numbers=("NCHW", "OIHW", "NCHW"))

    def bn(y, g, b):
        mean = y.mean(axis=(0, 2, 3), keepdims=True)
        var = ((y - mean) ** 2).mean(axis=(0, 2, 3), keepdims=True)
        return (y - mean) / jnp.sqrt(var + EPS) * g.reshape(1, -1, 1, 1) + b.reshape(1, -1, 1, 1)

    out = jax.nn.relu(bn(conv(x, params["w1"], stride, 1), params["g1"], params["b1"]))
    out = bn(conv(out, params["w2"], 1, 1), params["g2"], params["b2"])
    if stride != 1 or x.shape[1] != params["w1"].shape[0]:
        sc = bn(conv(x, params["ws"], stride, 0), params["gs"], params["bs"])
    else:
        sc = x
    return jax.nn.relu(out + sc)


# ---------------------------------------------------------------------------
if __name__ == "__main__":
    fwd = jax.jit(residual_block_forward, static_argnames=("stride", "tile_m"))
    TOL = 5e-2 if MATMUL_DTYPE == jnp.bfloat16 else 2e-3          # bf16 MXU operands vs f32 ref

    # --- projection-shortcut path (stride=2, Cin != Cout) ---
    N, Cin, Cout, H, W, stride = 2, 4, 8, 16, 16, 2
    key = jax.random.PRNGKey(0)
    k1, k2, k3, k4, k5, k6, k7, k8 = jax.random.split(key, 8)
    params = {
        "w1": 0.2 * jax.random.normal(k1, (Cout, Cin, 3, 3), jnp.float32),
        "g1": 1.0 + 0.1 * jax.random.normal(k4, (Cout,), jnp.float32),
        "b1": 0.1 * jax.random.normal(k5, (Cout,), jnp.float32),
        "w2": 0.2 * jax.random.normal(k2, (Cout, Cout, 3, 3), jnp.float32),
        "g2": 1.0 + 0.1 * jax.random.normal(k6, (Cout,), jnp.float32),
        "b2": 0.1 * jax.random.normal(k7, (Cout,), jnp.float32),
        "ws": 0.2 * jax.random.normal(k3, (Cout, Cin, 1, 1), jnp.float32),
        "gs": jnp.ones((Cout,), jnp.float32),
        "bs": jnp.zeros((Cout,), jnp.float32),
    }
    x = jax.random.normal(k8, (N, Cin, H, W), jnp.float32)

    # tile_m=64 keeps the toy problem multi-tile, exercising the cross-tile BN stats path.
    out = jax.block_until_ready(fwd(x, params, stride=stride, tile_m=64))
    ref = jax.block_until_ready(ref_residual_block(x, params, stride))
    assert out.shape == (N, Cout, H // stride, W // stride), out.shape
    assert jnp.allclose(out, ref, rtol=TOL, atol=TOL), float(jnp.max(jnp.abs(out - ref)))

    # --- identity-shortcut path (stride=1, Cin == Cout) ---
    kk1, kk2, kk3, kk4, kk5, kk6 = jax.random.split(jax.random.PRNGKey(1), 6)
    C = 8
    params_id = {
        "w1": 0.2 * jax.random.normal(kk1, (C, C, 3, 3), jnp.float32),
        "g1": 1.0 + 0.1 * jax.random.normal(kk2, (C,), jnp.float32),
        "b1": 0.1 * jax.random.normal(kk3, (C,), jnp.float32),
        "w2": 0.2 * jax.random.normal(kk4, (C, C, 3, 3), jnp.float32),
        "g2": 1.0 + 0.1 * jax.random.normal(kk5, (C,), jnp.float32),
        "b2": 0.1 * jax.random.normal(kk6, (C,), jnp.float32),
    }
    x_id = jax.random.normal(jax.random.PRNGKey(2), (2, C, 16, 16), jnp.float32)
    out_id = jax.block_until_ready(fwd(x_id, params_id, stride=1, tile_m=128))
    ref_id = jax.block_until_ready(ref_residual_block(x_id, params_id, stride=1))
    assert out_id.shape == x_id.shape, out_id.shape
    assert jnp.allclose(out_id, ref_id, rtol=TOL, atol=TOL), \
        float(jnp.max(jnp.abs(out_id - ref_id)))

    print("KERNEL_OK")
</pallas_src>

<mosaic_0001>
module attributes {stable_mosaic.version = 11 : i64} {
  func.func @conv_stats_kernel(%arg0: i32, %arg1: memref<64x128xbf16, #tpu.memory_space<vmem>>, %arg2: memref<128x128xbf16, #tpu.memory_space<vmem>>, %arg3: memref<1x1x128xf32, #tpu.memory_space<vmem>>, %arg4: memref<1x1x128xf32, #tpu.memory_space<vmem>>) attributes {dimension_semantics = [#tpu.dimension_semantics<parallel>], iteration_bounds = array<i64: 2>, scalar_prefetch = 0 : i64, scratch_operands = 0 : i64, tpu.core_type = #tpu.core_type<tc>, window_params = [{transform_indices = @transform_0, window_bounds = array<i64: 64, 128>}, {pipeline_mode = #tpu.pipeline_mode<synchronous>, transform_indices = @transform_1, window_bounds = array<i64: 128, 128>}, {transform_indices = @transform_2, window_bounds = array<i64: 1, 1, 128>}, {transform_indices = @transform_3, window_bounds = array<i64: 1, 1, 128>}]} {
    %c0 = arith.constant 0 : index
    %c0_0 = arith.constant 0 : index
    %0 = vector.load %arg1[%c0, %c0_0] : memref<64x128xbf16, #tpu.memory_space<vmem>>, vector<64x128xbf16>
    %c0_1 = arith.constant 0 : index
    %c0_2 = arith.constant 0 : index
    %1 = vector.load %arg2[%c0_1, %c0_2] : memref<128x128xbf16, #tpu.memory_space<vmem>>, vector<128x128xbf16>
    %cst = arith.constant dense<0.000000e+00> : vector<64x128xf32>
    %2 = tpu.matmul %0, %1, %cst {dimension_numbers = #tpu.dot_dimension_numbers<[1], [0], [0], [1], [0, 0, 1, 1], [], []>} : vector<64x128xbf16>, vector<128x128xbf16>, vector<64x128xf32> -> vector<64x128xf32>
    %cst_3 = arith.constant dense<0.000000e+00> : vector<128xf32>
    %3 = vector.multi_reduction <add>, %2, %cst_3 [0] : vector<64x128xf32> to vector<128xf32>
    %4 = vector.shape_cast %3 : vector<128xf32> to vector<1x128xf32>
    %c0_4 = arith.constant 0 : index
    %c0_5 = arith.constant 0 : index
    %c0_6 = arith.constant 0 : index
    %5 = vector.load %arg3[%c0_4, %c0_5, %c0_6] : memref<1x1x128xf32, #tpu.memory_space<vmem>>, vector<1x1x128xf32>
    %6 = vector.shape_cast %5 : vector<1x1x128xf32> to vector<1x128xf32>
    %7 = vector.shape_cast %4 : vector<1x128xf32> to vector<1x1x128xf32>
    tpu.vector_store %arg3[%c0_4, %c0_5, %c0_6], %7 {strides = array<i32>} : memref<1x1x128xf32, #tpu.memory_space<vmem>>, vector<1x1x128xf32>,
    %8 = arith.mulf %2, %2 : vector<64x128xf32>
    %cst_7 = arith.constant dense<0.000000e+00> : vector<128xf32>
    %9 = vector.multi_reduction <add>, %8, %cst_7 [0] : vector<64x128xf32> to vector<128xf32>
    %10 = vector.shape_cast %9 : vector<128xf32> to vector<1x128xf32>
    %c0_8 = arith.constant 0 : index
    %c0_9 = arith.constant 0 : index
    %c0_10 = arith.constant 0 : index
    %11 = vector.load %arg4[%c0_8, %c0_9, %c0_10] : memref<1x1x128xf32, #tpu.memory_space<vmem>>, vector<1x1x128xf32>
    %12 = vector.shape_cast %11 : vector<1x1x128xf32> to vector<1x128xf32>
    %13 = vector.shape_cast %10 : vector<1x128xf32> to vector<1x1x128xf32>
    tpu.vector_store %arg4[%c0_8, %c0_9, %c0_10], %13 {strides = array<i32>} : memref<1x1x128xf32, #tpu.memory_space<vmem>>, vector<1x1x128xf32>,
    return
  }
  func.func @transform_0(%arg0: i32) -> (i32, i32) {
    %c0_i32 = arith.constant 0 : i32
    %c0_i32_0 = arith.constant 0 : i32
    return %arg0, %c0_i32 : i32, i32
  }
  func.func @transform_1(%arg0: i32) -> (i32, i32) {
    %c0_i32 = arith.constant 0 : i32
    %c0_i32_0 = arith.constant 0 : i32
    %c0_i32_1 = arith.constant 0 : i32
    return %c0_i32, %c0_i32_0 : i32, i32
  }
  func.func @transform_2(%arg0: i32) -> (i32, i32, i32) {
    %c0_i32 = arith.constant 0 : i32
    %c0_i32_0 = arith.constant 0 : i32
    %c0_i32_1 = arith.constant 0 : i32
    return %arg0, %c0_i32, %c0_i32_0 : i32, i32, i32
  }
  func.func @transform_3(%arg0: i32) -> (i32, i32, i32) {
    %c0_i32 = arith.constant 0 : i32
    %c0_i32_0 = arith.constant 0 : i32
    %c0_i32_1 = arith.constant 0 : i32
    return %arg0, %c0_i32, %c0_i32_0 : i32, i32, i32
  }
}

module attributes {stable_mosaic.version = 11 : i64} {
  func.func @conv_affine_relu_kernel(%arg0: i32, %arg1: memref<64x128xbf16, #tpu.memory_space<vmem>>, %arg2: memref<128x128xbf16, #tpu.memory_space<vmem>>, %arg3: memref<1x128xf32, #tpu.memory_space<vmem>>, %arg4: memref<64x128xbf16, #tpu.memory_space<vmem>>) attributes {dimension_semantics = [#tpu.dimension_semantics<parallel>], iteration_bounds = array<i64: 2>, scalar_prefetch = 0 : i64, scratch_operands = 0 : i64, tpu.core_type = #tpu.core_type<tc>, window_params = [{transform_indices = @transform_0, window_bounds = array<i64: 64, 128>}, {pipeline_mode = #tpu.pipeline_mode<synchronous>, transform_indices = @transform_1, window_bounds = array<i64: 128, 128>}, {pipeline_mode = #tpu.pipeline_mode<synchronous>, transform_indices = @transform_2, window_bounds = array<i64: 1, 128>}, {transform_indices = @transform_3, window_bounds = array<i64: 64, 128>}]} {
    %c0 = arith.constant 0 : index
    %c0_0 = arith.constant 0 : index
    %0 = vector.load %arg1[%c0, %c0_0] : memref<64x128xbf16, #tpu.memory_space<vmem>>, vector<64x128xbf16>
    %c0_1 = arith.constant 0 : index
    %c0_2 = arith.constant 0 : index
    %1 = vector.load %arg2[%c0_1, %c0_2] : memref<128x128xbf16, #tpu.memory_space<vmem>>, vector<128x128xbf16>
    %cst = arith.constant dense<0.000000e+00> : vector<64x128xf32>
    %2 = tpu.matmul %0, %1, %cst {dimension_numbers = #tpu.dot_dimension_numbers<[1], [0], [0], [1], [0, 0, 1, 1], [], []>} : vector<64x128xbf16>, vector<128x128xbf16>, vector<64x128xf32> -> vector<64x128xf32>
    %c0_3 = arith.constant 0 : index
    %c0_4 = arith.constant 0 : index
    %3 = vector.load %arg3[%c0_3, %c0_4] : memref<1x128xf32, #tpu.memory_space<vmem>>, vector<1x128xf32>
    %4 = vector.broadcast %3 : vector<1x128xf32> to vector<64x128xf32>
    %5 = arith.addf %2, %4 : vector<64x128xf32>
    %cst_5 = arith.constant 0.000000e+00 : f32
    %6 = vector.broadcast %cst_5 : f32 to vector<64x128xf32>
    %7 = arith.maximumf %5, %6 : vector<64x128xf32>
    %8 = arith.truncf %7 : vector<64x128xf32> to vector<64x128xbf16>
    %c0_6 = arith.constant 0 : index
    %c0_7 = arith.constant 0 : index
    %9 = vector.load %arg4[%c0_6, %c0_7] : memref<64x128xbf16, #tpu.memory_space<vmem>>, vector<64x128xbf16>
    tpu.vector_store %arg4[%c0_6, %c0_7], %8 {strides = array<i32>} : memref<64x128xbf16, #tpu.memory_space<vmem>>, vector<64x128xbf16>,
    return
  }
  func.func @transform_0(%arg0: i32) -> (i32, i32) {
    %c0_i32 = arith.constant 0 : i32
    %c0_i32_0 = arith.constant 0 : i32
    return %arg0, %c0_i32 : i32, i32
  }
  func.func @transform_1(%arg0: i32) -> (i32, i32) {
    %c0_i32 = arith.constant 0 : i32
    %c0_i32_0 = arith.constant 0 : i32
    %c0_i32_1 = arith.constant 0 : i32
    return %c0_i32, %c0_i32_0 : i32, i32
  }
  func.func @transform_2(%arg0: i32) -> (i32, i32) {
    %c0_i32 = arith.constant 0 : i32
    %c0_i32_0 = arith.constant 0 : i32
    %c0_i32_1 = arith.constant 0 : i32
    return %c0_i32, %c0_i32_0 : i32, i32
  }
  func.func @transform_3(%arg0: i32) -> (i32, i32) {
    %c0_i32 = arith.constant 0 : i32
    %c0_i32_0 = arith.constant 0 : i32
    return %arg0, %c0_i32 : i32, i32
  }
}

module attributes {stable_mosaic.version = 11 : i64} {
  func.func @conv_stats_kernel(%arg0: i32, %arg1: memref<64x1152xbf16, #tpu.memory_space<vmem>>, %arg2: memref<1152x128xbf16, #tpu.memory_space<vmem>>, %arg3: memref<1x1x128xf32, #tpu.memory_space<vmem>>, %arg4: memref<1x1x128xf32, #tpu.memory_space<vmem>>) attributes {dimension_semantics = [#tpu.dimension_semantics<parallel>], iteration_bounds = array<i64: 2>, scalar_prefetch = 0 : i64, scratch_operands = 0 : i64, tpu.core_type = #tpu.core_type<tc>, window_params = [{transform_indices = @transform_0, window_bounds = array<i64: 64, 1152>}, {pipeline_mode = #tpu.pipeline_mode<synchronous>, transform_indices = @transform_1, window_bounds = array<i64: 1152, 128>}, {transform_indices = @transform_2, window_bounds = array<i64: 1, 1, 128>}, {transform_indices = @transform_3, window_bounds = array<i64: 1, 1, 128>}]} {
    %c0 = arith.constant 0 : index
    %c0_0 = arith.constant 0 : index
    %0 = vector.load %arg1[%c0, %c0_0] : memref<64x1152xbf16, #tpu.memory_space<vmem>>, vector<64x1152xbf16>
    %c0_1 = arith.constant 0 : index
    %c0_2 = arith.constant 0 : index
    %1 = vector.load %arg2[%c0_1, %c0_2] : memref<1152x128xbf16, #tpu.memory_space<vmem>>, vector<1152x128xbf16>
    %cst = arith.constant dense<0.000000e+00> : vector<64x128xf32>
    %2 = tpu.matmul %0, %1, %cst {dimension_numbers = #tpu.dot_dimension_numbers<[1], [0], [0], [1], [0, 0, 1, 1], [], []>} : vector<64x1152xbf16>, vector<1152x128xbf16>, vector<64x128xf32> -> vector<64x128xf32>
    %cst_3 = arith.constant dense<0.000000e+00> : vector<128xf32>
    %3 = vector.multi_reduction <add>, %2, %cst_3 [0] : vector<64x128xf32> to vector<128xf32>
    %4 = vector.shape_cast %3 : vector<128xf32> to vector<1x128xf32>
    %c0_4 = arith.constant 0 : index
    %c0_5 = arith.constant 0 : index
    %c0_6 = arith.constant 0 : index
    %5 = vector.load %arg3[%c0_4, %c0_5, %c0_6] : memref<1x1x128xf32, #tpu.memory_space<vmem>>, vector<1x1x128xf32>
    %6 = vector.shape_cast %5 : vector<1x1x128xf32> to vector<1x128xf32>
    %7 = vector.shape_cast %4 : vector<1x128xf32> to vector<1x1x128xf32>
    tpu.vector_store %arg3[%c0_4, %c0_5, %c0_6], %7 {strides = array<i32>} : memref<1x1x128xf32, #tpu.memory_space<vmem>>, vector<1x1x128xf32>,
    %8 = arith.mulf %2, %2 : vector<64x128xf32>
    %cst_7 = arith.constant dense<0.000000e+00> : vector<128xf32>
    %9 = vector.multi_reduction <add>, %8, %cst_7 [0] : vector<64x128xf32> to vector<128xf32>
    %10 = vector.shape_cast %9 : vector<128xf32> to vector<1x128xf32>
    %c0_8 = arith.constant 0 : index
    %c0_9 = arith.constant 0 : index
    %c0_10 = arith.constant 0 : index
    %11 = vector.load %arg4[%c0_8, %c0_9, %c0_10] : memref<1x1x128xf32, #tpu.memory_space<vmem>>, vector<1x1x128xf32>
    %12 = vector.shape_cast %11 : vector<1x1x128xf32> to vector<1x128xf32>
    %13 = vector.shape_cast %10 : vector<1x128xf32> to vector<1x1x128xf32>
    tpu.vector_store %arg4[%c0_8, %c0_9, %c0_10], %13 {strides = array<i32>} : memref<1x1x128xf32, #tpu.memory_space<vmem>>, vector<1x1x128xf32>,
    return
  }
  func.func @transform_0(%arg0: i32) -> (i32, i32) {
    %c0_i32 = arith.constant 0 : i32
    %c0_i32_0 = arith.constant 0 : i32
    return %arg0, %c0_i32 : i32, i32
  }
  func.func @transform_1(%arg0: i32) -> (i32, i32) {
    %c0_i32 = arith.constant 0 : i32
    %c0_i32_0 = arith.constant 0 : i32
    %c0_i32_1 = arith.constant 0 : i32
    return %c0_i32, %c0_i32_0 : i32, i32
  }
  func.func @transform_2(%arg0: i32) -> (i32, i32, i32) {
    %c0_i32 = arith.constant 0 : i32
    %c0_i32_0 = arith.constant 0 : i32
    %c0_i32_1 = arith.constant 0 : i32
    return %arg0, %c0_i32, %c0_i32_0 : i32, i32, i32
  }
  func.func @transform_3(%arg0: i32) -> (i32, i32, i32) {
    %c0_i32 = arith.constant 0 : i32
    %c0_i32_0 = arith.constant 0 : i32
    %c0_i32_1 = arith.constant 0 : i32
    return %arg0, %c0_i32, %c0_i32_0 : i32, i32, i32
  }
}

module attributes {stable_mosaic.version = 11 : i64} {
  func.func @conv_affine_relu_kernel(%arg0: i32, %arg1: memref<64x1280xbf16, #tpu.memory_space<vmem>>, %arg2: memref<1280x128xbf16, #tpu.memory_space<vmem>>, %arg3: memref<1x128xf32, #tpu.memory_space<vmem>>, %arg4: memref<64x128xf32, #tpu.memory_space<vmem>>) attributes {dimension_semantics = [#tpu.dimension_semantics<parallel>], iteration_bounds = array<i64: 2>, scalar_prefetch = 0 : i64, scratch_operands = 0 : i64, tpu.core_type = #tpu.core_type<tc>, window_params = [{transform_indices = @transform_0, window_bounds = array<i64: 64, 1280>}, {pipeline_mode = #tpu.pipeline_mode<synchronous>, transform_indices = @transform_1, window_bounds = array<i64: 1280, 128>}, {pipeline_mode = #tpu.pipeline_mode<synchronous>, transform_indices = @transform_2, window_bounds = array<i64: 1, 128>}, {transform_indices = @transform_3, window_bounds = array<i64: 64, 128>}]} {
    %c0 = arith.constant 0 : index
    %c0_0 = arith.constant 0 : index
    %0 = vector.load %arg1[%c0, %c0_0] : memref<64x1280xbf16, #tpu.memory_space<vmem>>, vector<64x1280xbf16>
    %c0_1 = arith.constant 0 : index
    %c0_2 = arith.constant 0 : index
    %1 = vector.load %arg2[%c0_1, %c0_2] : memref<1280x128xbf16, #tpu.memory_space<vmem>>, vector<1280x128xbf16>
    %cst = arith.constant dense<0.000000e+00> : vector<64x128xf32>
    %2 = tpu.matmul %0, %1, %cst {dimension_numbers = #tpu.dot_dimension_numbers<[1], [0], [0], [1], [0, 0, 1, 1], [], []>} : vector<64x1280xbf16>, vector<1280x128xbf16>, vector<64x128xf32> -> vector<64x128xf32>
    %c0_3 = arith.constant 0 : index
    %c0_4 = arith.constant 0 : index
    %3 = vector.load %arg3[%c0_3, %c0_4] : memref<1x128xf32, #tpu.memory_space<vmem>>, vector<1x128xf32>
    %4 = vector.broadcast %3 : vector<1x128xf32> to vector<64x128xf32>
    %5 = arith.addf %2, %4 : vector<64x128xf32>
    %cst_5 = arith.constant 0.000000e+00 : f32
    %6 = vector.broadcast %cst_5 : f32 to vector<64x128xf32>
    %7 = arith.maximumf %5, %6 : vector<64x128xf32>
    %c0_6 = arith.constant 0 : index
    %c0_7 = arith.constant 0 : index
    %8 = vector.load %arg4[%c0_6, %c0_7] : memref<64x128xf32, #tpu.memory_space<vmem>>, vector<64x128xf32>
    tpu.vector_store %arg4[%c0_6, %c0_7], %7 {strides = array<i32>} : memref<64x128xf32, #tpu.memory_space<vmem>>, vector<64x128xf32>,
    return
  }
  func.func @transform_0(%arg0: i32) -> (i32, i32) {
    %c0_i32 = arith.constant 0 : i32
    %c0_i32_0 = arith.constant 0 : i32
    return %arg0, %c0_i32 : i32, i32
  }
  func.func @transform_1(%arg0: i32) -> (i32, i32) {
    %c0_i32 = arith.constant 0 : i32
    %c0_i32_0 = arith.constant 0 : i32
    %c0_i32_1 = arith.constant 0 : i32
    return %c0_i32, %c0_i32_0 : i32, i32
  }
  func.func @transform_2(%arg0: i32) -> (i32, i32) {
    %c0_i32 = arith.constant 0 : i32
    %c0_i32_0 = arith.constant 0 : i32
    %c0_i32_1 = arith.constant 0 : i32
    return %c0_i32, %c0_i32_0 : i32, i32
  }
  func.func @transform_3(%arg0: i32) -> (i32, i32) {
    %c0_i32 = arith.constant 0 : i32
    %c0_i32_0 = arith.constant 0 : i32
    return %arg0, %c0_i32 : i32, i32
  }
}

</mosaic_0001>

<bundles_post_ra>
// kernel: residual_block_forward.6
= control target key start
LH: loop header
LB: loop body
LE: loop exit
PB: predicated region body
PF: predicated region fallthrough
CT: control target
= control target key end

     0   :  { %s610_s12 = smov 0   ;;  %s667_s0 = inlined_call_operand.vmem [shape: bf16[128,128], index: 0, kind: input, shape index: {}]   ;;  %s668_s1 = inlined_call_operand.vmem [shape: bf16[128,128], index: 1, kind: input, shape index: {}]   ;;  %s669_s2 = inlined_call_operand.vmem [shape: f32[1,128], index: 2, kind: input, shape index: {}]   ;;  %s670_s3 = inlined_call_operand.vmem [shape: bf16[128,128], index: 3, kind: output, shape index: {}]  }
   0x1 LB: > { %s447_s13 = sadd.s32 4294967295, %s588_s12   ;;  %p451_p0 = scmp.ge.s32.totalorder %s588_s12, 1  ;;  %s588_s12 = sphi %s610_s12, %s13_s12  }
   0x2   : > { %p138_p1 = scmp.lt.s32.totalorder %s588_s12, 3 }
   0x4   : > { %p139_p2 = pnand %p451_p0, %p138_p1 }
   0x5   : > { %v570_v0 = vld [vmem:[%s668_s1] sm:$0xff] (!%p139_p2)   ;;  %s452_s16 = sshll.u32 (!%p139_p2), %s447_s13, 3  ;;  %v571_v1 = vld [vmem:[%s668_s1 + $0x8] sm:$0xff] (!%p139_p2)   ;;  %v572_v2 = vld [vmem:[%s668_s1 + $0x10] sm:$0xff] (!%p139_p2)  }
   0x6   : > { %142 = sbr.rel (%p139_p2) target bundleno = 260 (0x104), region = 32  ;;  %p163_p3 = scmp.lt.s32.totalorder (!%p139_p2), %s452_s16, 15  ;;  %522 = vmatprep.subr.bf16.mxu0 (!%p139_p2), %v570_v0  ;;  %546 = vmatprep.subr.bf16.mxu1 (!%p139_p2), %v570_v0  ;;  %v573_v3 = vld [vmem:[%s668_s1 + $0x18] sm:$0xff] (!%p139_p2)   ;;  %v574_v6 = vld [vmem:[%s668_s1 + $0x20] sm:$0xff] (!%p139_p2)   ;;  %v575_v7 = vld [vmem:[%s668_s1 + $0x28] sm:$0xff] (!%p139_p2)  }
   0x7   : > { %523 = vmatpush3.bf16.msra.mxu0 (!%p139_p2), %v570_v0  ;;  %554 = vmatpush3.bf16.msra.mxu1 (!%p139_p2), %v570_v0  ;;  %v576_v8 = vld [vmem:[%s668_s1 + $0x30] sm:$0xff] (!%p139_p2)   ;;  %v577_v9 = vld [vmem:[%s668_s1 + $0x38] sm:$0xff] (!%p139_p2)   ;;  %v456_v12 = vld [vmem:[%s669_s2] ss:$0 sm:$0xff] (!%p139_p2) }
   0x8   : > { %524 = vmatprep.subr.bf16.mxu0 (!%p139_p2), %v571_v1  ;;  %547 = vmatprep.subr.bf16.mxu1 (!%p139_p2), %v571_v1 }
   0xb   : > { %525 = vmatpush3.bf16.msra.mxu0 (!%p139_p2), %v571_v1  ;;  %555 = vmatpush3.bf16.msra.mxu1 (!%p139_p2), %v571_v1 }
   0xc   : > { %526 = vmatprep.subr.bf16.mxu0 (!%p139_p2), %v572_v2  ;;  %548 = vmatprep.subr.bf16.mxu1 (!%p139_p2), %v572_v2 }
   0xd   : > { %s672_s16 = smov (!%p163_p3, %s452_s16), 15 }
   0xe   : > { %s453_s21 = sshll.u32 %s672_s16, 2 }
   0xf   : > { %s635_s24 = scalar_lea.vmem %s667_s0, %s453_s21  ;;  %527 = vmatpush3.bf16.msra.mxu0 %v572_v2  ;;  %556 = vmatpush3.bf16.msra.mxu1 %v572_v2  ;;  %s172_s13 = scalar_lea.vmem %s670_s3, %s453_s21 }
  0x10   : > { %v578_v4 = vld [vmem:[%s635_s24] sm:$0xff]   ;;  %v579_v5 = vld [vmem:[%s635_s24 + $0x10] sm:$0xff]   ;;  %528 = vmatprep.subr.bf16.mxu0 %v573_v3  ;;  %549 = vmatprep.subr.bf16.mxu1 %v573_v3  ;;  %v580_v10 = vld [vmem:[%s635_s24 + $0x8] sm:$0xff]  }
  0x11   : > { %538 = vmatprep.mubr.bf16.mxu0 %v578_v4  ;;  %542 = vmatprep.mubr.bf16.mxu1 %v579_v5  ;;  %v581_v11 = vld [vmem:[%s635_s24 + $0x18] sm:$0xff]  }
  0x13   : > { %529 = vmatpush3.bf16.msra.mxu0 %v573_v3  ;;  %557 = vmatpush3.bf16.msra.mxu1 %v573_v3 }
  0x14   : > { %530 = vmatprep.subr.bf16.mxu0 %v574_v6  ;;  %550 = vmatprep.subr.bf16.mxu1 %v574_v6 }
  0x17   : > { %531 = vmatpush3.bf16.msra.mxu0 %v574_v6  ;;  %558 = vmatpush3.bf16.msra.mxu1 %v574_v6 }
  0x18   : > { %532 = vmatprep.subr.bf16.mxu0 %v575_v7  ;;  %551 = vmatprep.subr.bf16.mxu1 %v575_v7 }
  0x1b   : > { %533 = vmatpush3.bf16.msra.mxu0 %v575_v7  ;;  %559 = vmatpush3.bf16.msra.mxu1 %v575_v7 }
  0x1c   : > { %534 = vmatprep.subr.bf16.mxu0 %v576_v8  ;;  %552 = vmatprep.subr.bf16.mxu1 %v576_v8 }
  0x1f   : > { %535 = vmatpush3.bf16.msra.mxu0 %v576_v8  ;;  %560 = vmatpush3.bf16.msra.mxu1 %v576_v8 }
  0x20   : > { %536 = vmatprep.subr.bf16.mxu0 %v577_v9  ;;  %553 = vmatprep.subr.bf16.mxu1 %v577_v9 }
  0x23   : > { %537 = vmatpush3.bf16.msra.mxu0 %v577_v9  ;;  %561 = vmatpush3.bf16.msra.mxu1 %v577_v9 }
  0x26   : > { %539 = vmatmul.mubr.bf16.vlgmr.msra.gmra.mrb[0].mxu0 %v580_v10  ;;  %543 = vmatmul.mubr.bf16.vlgmr.msra.gmra.mrb[0].mxu1 %v581_v11 }
  0xf9   : > { %v540_v13 = vpop.f32.mrb[0].mxu0  ;;  %v544_v14 = vpop.f32.mrb[0].mxu1 }
  0xfa   : > { %v321_v15 = vadd.f32 %v540_v13, %v456_v12  ;;  %v337_v16 = vadd.f32 %v544_v14, %v456_v12  ;;  %v312_v17 = vpop.f32.mrb[1].mxu0  ;;  %v328_v18 = vpop.f32.mrb[1].mxu1 }
  0xfb   : > { %v313_v19 = vadd.f32 %v456_v12, %v312_v17  ;;  %v329_v20 = vadd.f32 %v456_v12, %v328_v18  ;;  %v541_v21 = vpop.f32.mrb[2].mxu0  ;;  %v545_v22 = vpop.f32.mrb[2].mxu1 }
  0xfc   : > { %v324_v23 = vadd.f32 %v541_v21, %v456_v12  ;;  %v340_v24 = vadd.f32 %v545_v22, %v456_v12  ;;  %v315_v25 = vpop.f32.mrb[3].mxu0  ;;  %v331_v26 = vpop.f32.mrb[3].mxu1  ;;  %v345_v29 = vmax.f32 %v321_v15, 0.0  ;;  %v349_v30 = vmax.f32 %v337_v16, 0.0 }
  0xfd   : > { %v316_v27 = vadd.f32 %v456_v12, %v315_v25  ;;  %v332_v28 = vadd.f32 %v456_v12, %v331_v26  ;;  %v343_v33 = vmax.f32 %v313_v19, 0.0  ;;  %v347_v34 = vmax.f32 %v329_v20, 0.0 }
  0xfe   : > { %v346_v31 = vmax.f32 %v324_v23, 0.0  ;;  %v350_v32 = vmax.f32 %v340_v24, 0.0 }
  0xff   : > { %v344_v35 = vmax.f32 %v316_v27, 0.0  ;;  %v348_v36 = vmax.f32 %v332_v28, 0.0 }
 0x100   : > { %v495_v37 = vpack.c.bf16 %v346_v31, %v345_v29  ;;  %v505_v38 = vpack.c.bf16 %v350_v32, %v349_v30 }
 0x101   : > { %v490_v39 = vpack.c.bf16 %v344_v35, %v343_v33  ;;  %v500_v40 = vpack.c.bf16 %v348_v36, %v347_v34 }
 0x102   : > { %507 = vst [vmem:[%s172_s13 + $0x8] sm:$0xff] %v495_v37   ;;  %509 = vst [vmem:[%s172_s13 + $0x18] sm:$0xff] %v505_v38  }
 0x103   : > { %491 = vst [vmem:[%s172_s13] sm:$0xff] %v490_v39   ;;  %508 = vst [vmem:[%s172_s13 + $0x10] sm:$0xff] %v500_v40  }
 0x104 PF: > { %s13_s12 = sadd.s32 1, %s588_s12  }
 0x105   : > { %p10_p4 = scmp.ge.s32.totalorder %s13_s12, 4  }
 0x107   :  { %12 = sbr.rel (!%p10_p4) target bundleno = 1 (0x1), region = 62 }

// kernel: residual_block_forward.5
= control target key start
LH: loop header
LB: loop body
LE: loop exit
PB: predicated region body
PF: predicated region fallthrough
CT: control target
= control target key end

     0   :  { %s569_s12 = smov 0   ;;  %s624_s0 = inlined_call_operand.vmem [shape: bf16[128,128], index: 0, kind: input, shape index: {}]   ;;  %s625_s1 = inlined_call_operand.vmem [shape: bf16[128,128], index: 1, kind: input, shape index: {}]   ;;  %s626_s2 = inlined_call_operand.vmem [shape: f32[2,1,128], index: 2, kind: output, shape index: {0}]   ;;  %s627_s3 = inlined_call_operand.vmem [shape: f32[2,1,128], index: 3, kind: output, shape index: {1}]  }
   0x1 LB: > { %s575_s13 = sadd.s32 4294967295, %s547_s12   ;;  %p452_p0 = scmp.ge.s32.totalorder %s547_s12, 1  ;;  %s547_s12 = sphi %s569_s12, %s14_s12  }
   0x2   : > { %p141_p1 = scmp.lt.s32.totalorder %s547_s12, 3 }
   0x4   : > { %p142_p2 = pnand %p452_p0, %p141_p1 }
   0x5   : > { %v529_v0 = vld [vmem:[%s625_s1] sm:$0xff] (!%p142_p2)   ;;  %s453_s16 = sshll.u32 (!%p142_p2), %s575_s13, 3  ;;  %v530_v1 = vld [vmem:[%s625_s1 + $0x8] sm:$0xff] (!%p142_p2)   ;;  %v531_v2 = vld [vmem:[%s625_s1 + $0x10] sm:$0xff] (!%p142_p2)   ;;  %p172_p4 = scmp.lt.s32.totalorder (!%p142_p2), %s575_s13, 1 }
   0x6   : > { %145 = sbr.rel (%p142_p2) target bundleno = 282 (0x11a), region = 28  ;;  %p167_p3 = scmp.lt.s32.totalorder (!%p142_p2), %s453_s16, 15  ;;  %481 = vmatprep.subr.bf16.mxu0 (!%p142_p2), %v529_v0  ;;  %505 = vmatprep.subr.bf16.mxu1 (!%p142_p2), %v529_v0  ;;  %v532_v3 = vld [vmem:[%s625_s1 + $0x18] sm:$0xff] (!%p142_p2)   ;;  %v533_v6 = vld [vmem:[%s625_s1 + $0x20] sm:$0xff] (!%p142_p2)   ;;  %v534_v7 = vld [vmem:[%s625_s1 + $0x28] sm:$0xff] (!%p142_p2)  }
   0x7   : > { %482 = vmatpush3.bf16.msra.mxu0 (!%p142_p2), %v529_v0  ;;  %513 = vmatpush3.bf16.msra.mxu1 (!%p142_p2), %v529_v0  ;;  %v535_v8 = vld [vmem:[%s625_s1 + $0x30] sm:$0xff] (!%p142_p2)   ;;  %v536_v9 = vld [vmem:[%s625_s1 + $0x38] sm:$0xff] (!%p142_p2)  }
   0x8   : > { %483 = vmatprep.subr.bf16.mxu0 (!%p142_p2), %v530_v1  ;;  %506 = vmatprep.subr.bf16.mxu1 (!%p142_p2), %v530_v1 }
   0xb   : > { %484 = vmatpush3.bf16.msra.mxu0 (!%p142_p2), %v530_v1  ;;  %514 = vmatpush3.bf16.msra.mxu1 (!%p142_p2), %v530_v1 }
   0xc   : > { %485 = vmatprep.subr.bf16.mxu0 (!%p142_p2), %v531_v2  ;;  %507 = vmatprep.subr.bf16.mxu1 (!%p142_p2), %v531_v2 }
   0xd   : > { %s629_s16 = smov (!%p167_p3, %s453_s16), 15  ;;  %s631_s13 = smov (!%p172_p4, %s575_s13), 1 }
   0xe   : > { %s454_s21 = sshll.u32 %s629_s16, 2  ;;  %s174_s10 = scalar_lea.vmem %s626_s2, %s631_s13 }
   0xf   : > { %s592_s24 = scalar_lea.vmem %s624_s0, %s454_s21  ;;  %486 = vmatpush3.bf16.msra.mxu0 %v531_v2  ;;  %515 = vmatpush3.bf16.msra.mxu1 %v531_v2  ;;  %s177_s15 = scalar_lea.vmem %s627_s3, %s631_s13 }
  0x10   : > { %v537_v4 = vld [vmem:[%s592_s24] sm:$0xff]   ;;  %v539_v5 = vld [vmem:[%s592_s24 + $0x10] sm:$0xff]   ;;  %487 = vmatprep.subr.bf16.mxu0 %v532_v3  ;;  %508 = vmatprep.subr.bf16.mxu1 %v532_v3  ;;  %v538_v10 = vld [vmem:[%s592_s24 + $0x8] sm:$0xff]  }
  0x11   : > { %497 = vmatprep.mubr.bf16.mxu0 %v537_v4  ;;  %501 = vmatprep.mubr.bf16.mxu1 %v539_v5  ;;  %v540_v11 = vld [vmem:[%s592_s24 + $0x18] sm:$0xff]  }
  0x13   : > { %488 = vmatpush3.bf16.msra.mxu0 %v532_v3  ;;  %516 = vmatpush3.bf16.msra.mxu1 %v532_v3 }
  0x14   : > { %489 = vmatprep.subr.bf16.mxu0 %v533_v6  ;;  %509 = vmatprep.subr.bf16.mxu1 %v533_v6 }
  0x17   : > { %490 = vmatpush3.bf16.msra.mxu0 %v533_v6  ;;  %517 = vmatpush3.bf16.msra.mxu1 %v533_v6 }
  0x18   : > { %491 = vmatprep.subr.bf16.mxu0 %v534_v7  ;;  %510 = vmatprep.subr.bf16.mxu1 %v534_v7 }
  0x1b   : > { %492 = vmatpush3.bf16.msra.mxu0 %v534_v7  ;;  %518 = vmatpush3.bf16.msra.mxu1 %v534_v7 }
  0x1c   : > { %493 = vmatprep.subr.bf16.mxu0 %v535_v8  ;;  %511 = vmatprep.subr.bf16.mxu1 %v535_v8 }
  0x1f   : > { %494 = vmatpush3.bf16.msra.mxu0 %v535_v8  ;;  %519 = vmatpush3.bf16.msra.mxu1 %v535_v8 }
  0x20   : > { %495 = vmatprep.subr.bf16.mxu0 %v536_v9  ;;  %512 = vmatprep.subr.bf16.mxu1 %v536_v9 }
  0x23   : > { %496 = vmatpush3.bf16.msra.mxu0 %v536_v9  ;;  %520 = vmatpush3.bf16.msra.mxu1 %v536_v9 }
  0x26   : > { %498 = vmatmul.mubr.bf16.vlgmr.msra.gmra.mrb[0].mxu0 %v538_v10  ;;  %502 = vmatmul.mubr.bf16.vlgmr.msra.gmra.mrb[0].mxu1 %v540_v11 }
  0xf9   : > { %v499_v12 = vpop.f32.mrb[0].mxu0  ;;  %v503_v13 = vpop.f32.mrb[0].mxu1 }
  0xfa   : > { %v309_v14 = vpop.f32.mrb[1].mxu0  ;;  %v325_v15 = vpop.f32.mrb[1].mxu1  ;;  %v356_v23 = vmul.f32 %v499_v12, %v499_v12  ;;  %v360_v35 = vmul.f32 %v503_v13, %v503_v13 }
  0xfb   : > { %v500_v16 = vpop.f32.mrb[2].mxu0  ;;  %v504_v17 = vpop.f32.mrb[2].mxu1  ;;  %v354_v20 = vmul.f32 %v309_v14, %v309_v14  ;;  %v358_v29 = vmul.f32 %v325_v15, %v325_v15 }
  0xfc   : > { %v312_v18 = vpop.f32.mrb[3].mxu0  ;;  %v328_v19 = vpop.f32.mrb[3].mxu1  ;;  %v357_v26 = vmul.f32 %v500_v16, %v500_v16  ;;  %v361_v38 = vmul.f32 %v504_v17, %v504_v17 }
  0xfd   : > { %v340_v21 = vadd.f32 %v312_v18, %v309_v14  ;;  %v355_v22 = vmul.f32 %v312_v18, %v312_v18  ;;  %v359_v34 = vmul.f32 %v328_v19, %v328_v19 }
  0xff   : > { %v341_v24 = vadd.f32 %v499_v12, %v340_v21  ;;  %v362_v25 = vadd.f32 %v355_v22, %v354_v20 }
 0x101   : > { %v363_v27 = vadd.f32 %v362_v25, %v356_v23  ;;  %v342_v28 = vadd.f32 %v500_v16, %v341_v24 }
 0x103   : > { %v343_v30 = vadd.f32 %v342_v28, %v325_v15  ;;  %v364_v31 = vadd.f32 %v363_v27, %v357_v26 }
 0x105   : > { %v365_v32 = vadd.f32 %v364_v31, %v358_v29  ;;  %v344_v33 = vadd.f32 %v343_v30, %v328_v19 }
 0x107   : > { %v345_v36 = vadd.f32 %v503_v13, %v344_v33  ;;  %v366_v37 = vadd.f32 %v365_v32, %v359_v34 }
 0x109   : > { %v346_v39 = vadd.f32 %v504_v17, %v345_v36  ;;  %v367_v40 = vadd.f32 %v366_v37, %v360_v35 }
 0x10b   : > { %v347_v41 = vrot.slane %v346_v39, 4  ;;  %v368_v42 = vadd.f32 %v367_v40, %v361_v38 }
 0x10d   : > { %v348_v43 = vadd.f32 %v347_v41, %v346_v39  ;;  %v369_v44 = vrot.slane %v368_v42, 4 }
 0x10f   : > { %v349_v45 = vrot.slane %v348_v43, 2  ;;  %v370_v46 = vadd.f32 %v369_v44, %v368_v42 }
 0x111   : > { %v350_v47 = vadd.f32 %v349_v45, %v348_v43  ;;  %v371_v48 = vrot.slane %v370_v46, 2 }
 0x113   : > { %v351_v49 = vrot.slane %v350_v47, 1  ;;  %v372_v50 = vadd.f32 %v371_v48, %v370_v46 }
 0x115   : > { %v352_v51 = vadd.f32 %v351_v49, %v350_v47  ;;  %v373_v52 = vrot.slane %v372_v50, 1 }
 0x117   : > { %353 = vst [vmem:[%s174_s10] sm:$0x1] %v352_v51  ;;  %v374_v53 = vadd.f32 %v373_v52, %v372_v50 }
 0x119   : > { %375 = vst [vmem:[%s177_s15] sm:$0x1] %v374_v53 }
 0x11a PF: > { %s14_s12 = sadd.s32 1, %s547_s12  }
 0x11b   : > { %p11_p5 = scmp.ge.s32.totalorder %s14_s12, 4  }
 0x11d   :  { %13 = sbr.rel (!%p11_p5) target bundleno = 1 (0x1), region = 70 }

// kernel: residual_block_forward.7
= control target key start
LH: loop header
LB: loop body
LE: loop exit
PB: predicated region body
PF: predicated region fallthrough
CT: control target
= control target key end

     0   :  { %s1905_s12 = smov 0   ;;  %s2184_s0 = inlined_call_operand.vmem [shape: bf16[128,1152], index: 0, kind: input, shape index: {}]   ;;  %s2185_s1 = inlined_call_operand.vmem [shape: bf16[1152,128], index: 1, kind: input, shape index: {}]   ;;  %s2186_s2 = inlined_call_operand.vmem [shape: f32[2,1,128], index: 2, kind: output, shape index: {0}]   ;;  %s2187_s3 = inlined_call_operand.vmem [shape: f32[2,1,128], index: 3, kind: output, shape index: {1}]  }
   0x1 LB: > { %s1911_s13 = sadd.s32 4294967295, %s1883_s12   ;;  %p1419_p0 = scmp.ge.s32.totalorder %s1883_s12, 1  ;;  %s1883_s12 = sphi %s1905_s12, %s14_s12  }
   0x2   : > { %p142_p1 = scmp.lt.s32.totalorder %s1883_s12, 3 }
   0x4   : > { %p143_p2 = pnand %p1419_p0, %p142_p1 }
   0x5   : > { %v1753_v0 = vld [vmem:[%s2185_s1 + $0x40] sm:$0xff] (!%p143_p2)   ;;  %v1757_v4 = vld [vmem:[%s2185_s1 + $0x48] sm:$0xff] (!%p143_p2)   ;;  %v1761_v8 = vld [vmem:[%s2185_s1 + $0x50] sm:$0xff] (!%p143_p2)   ;;  %s1420_s19 = sshll.u32 (!%p143_p2), %s1911_s13, 3  ;;  %p175_p4 = scmp.lt.s32.totalorder (!%p143_p2), %s1911_s13, 1 }
   0x6   : > { %146 = sbr.rel (%p143_p2) target bundleno = 350 (0x15e), region = 28  ;;  %v1754_v1 = vld [vmem:[%s2185_s1 + $0xc0] sm:$0xff] (!%p143_p2)   ;;  %1532 = vmatprep.subr.bf16.mxu0 (!%p143_p2), %v1753_v0  ;;  %v1758_v5 = vld [vmem:[%s2185_s1 + $0xc8] sm:$0xff] (!%p143_p2)   ;;  %v1762_v9 = vld [vmem:[%s2185_s1 + $0xd0] sm:$0xff] (!%p143_p2)   ;;  %p169_p3 = scmp.lt.s32.totalorder (!%p143_p2), %s1420_s19, 15 }
   0x7   : > { %v1755_v2 = vld [vmem:[%s2185_s1] sm:$0xff] (!%p143_p2)   ;;  %1572 = vmatprep.subr.bf16.mxu1 (!%p143_p2), %v1754_v1  ;;  %v1759_v6 = vld [vmem:[%s2185_s1 + $0x8] sm:$0xff] (!%p143_p2)   ;;  %v1763_v10 = vld [vmem:[%s2185_s1 + $0x10] sm:$0xff] (!%p143_p2)  }
   0x8   : > { %v1756_v3 = vld [vmem:[%s2185_s1 + $0x80] sm:$0xff] (!%p143_p2)   ;;  %1533 = vmatpush3.bf16.msra.mxu0 (!%p143_p2), %v1755_v2  ;;  %v1760_v7 = vld [vmem:[%s2185_s1 + $0x88] sm:$0xff] (!%p143_p2)   ;;  %v1764_v11 = vld [vmem:[%s2185_s1 + $0x90] sm:$0xff] (!%p143_p2)  }
   0x9   : > { %1573 = vmatpush3.bf16.msra.mxu1 (!%p143_p2), %v1756_v3  ;;  %1534 = vmatprep.subr.bf16.mxu0 (!%p143_p2), %v1757_v4  ;;  %v1765_v12 = vld [vmem:[%s2185_s1 + $0x58] sm:$0xff] (!%p143_p2)   ;;  %v1769_v16 = vld [vmem:[%s2185_s1 + $0x60] sm:$0xff] (!%p143_p2)   ;;  %v1773_v20 = vld [vmem:[%s2185_s1 + $0x68] sm:$0xff] (!%p143_p2)  }
   0xa   : > { %1574 = vmatprep.subr.bf16.mxu1 (!%p143_p2), %v1758_v5  ;;  %v1766_v13 = vld [vmem:[%s2185_s1 + $0xd8] sm:$0xff] (!%p143_p2)   ;;  %v1770_v17 = vld [vmem:[%s2185_s1 + $0xe0] sm:$0xff] (!%p143_p2)   ;;  %v1774_v21 = vld [vmem:[%s2185_s1 + $0xe8] sm:$0xff] (!%p143_p2)  }
   0xb   : > { %v1767_v14 = vld [vmem:[%s2185_s1 + $0x18] sm:$0xff] (!%p143_p2)   ;;  %v1771_v18 = vld [vmem:[%s2185_s1 + $0x20] sm:$0xff] (!%p143_p2)   ;;  %v1775_v22 = vld [vmem:[%s2185_s1 + $0x28] sm:$0xff] (!%p143_p2)  }
   0xc   : > { %1535 = vmatpush3.bf16.msra.mxu0 (!%p143_p2), %v1759_v6  ;;  %v1768_v15 = vld [vmem:[%s2185_s1 + $0x98] sm:$0xff] (!%p143_p2)   ;;  %v1772_v19 = vld [vmem:[%s2185_s1 + $0xa0] sm:$0xff] (!%p143_p2)   ;;  %v1776_v23 = vld [vmem:[%s2185_s1 + $0xa8] sm:$0xff] (!%p143_p2)  }
   0xd   : > { %1575 = vmatpush3.bf16.msra.mxu1 %v1760_v7  ;;  %1536 = vmatprep.subr.bf16.mxu0 %v1761_v8  ;;  %s2189_s19 = smov (!%p169_p3, %s1420_s19), 15  ;;  %v1777_v24 = vld [vmem:[%s2185_s1 + $0x70] sm:$0xff]   ;;  %v1781_v28 = vld [vmem:[%s2185_s1 + $0x78] sm:$0xff]   ;;  %v1791_v36 = vld [vmem:[%s2185_s1 + $0x140] sm:$0xff]   ;;  %s2191_s13 = smov (!%p175_p4, %s1911_s13), 1 }
   0xe   : > { %1576 = vmatprep.subr.bf16.mxu1 %v1762_v9  ;;  %v1778_v25 = vld [vmem:[%s2185_s1 + $0xf0] sm:$0xff]   ;;  %s1744_s17 = smul.u32 36, %s2189_s19  ;;  %v1782_v29 = vld [vmem:[%s2185_s1 + $0xf8] sm:$0xff]   ;;  %v1792_v37 = vld [vmem:[%s2185_s1 + $0x1c0] sm:$0xff]   ;;  %s180_s21 = scalar_lea.vmem %s2187_s3, %s2191_s13 }
   0xf   : > { %v1779_v26 = vld [vmem:[%s2185_s1 + $0x30] sm:$0xff]   ;;  %v1783_v30 = vld [vmem:[%s2185_s1 + $0x38] sm:$0xff]   ;;  %v1793_v38 = vld [vmem:[%s2185_s1 + $0x100] sm:$0xff]  }
  0x10   : > { %1537 = vmatpush3.bf16.msra.mxu0 %v1763_v10  ;;  %v1780_v27 = vld [vmem:[%s2185_s1 + $0xb0] sm:$0xff]   ;;  %s2009_s28 = scalar_lea.vmem %s2184_s0, %s1744_s17  ;;  %v1784_v31 = vld [vmem:[%s2185_s1 + $0xb8] sm:$0xff]   ;;  %v1794_v39 = vld [vmem:[%s2185_s1 + $0x180] sm:$0xff]   ;;  %s177_s17 = scalar_lea.vmem %s2186_s2, %s2191_s13 }
  0x11   : > { %1577 = vmatpush3.bf16.msra.mxu1 %v1764_v11  ;;  %1538 = vmatprep.subr.bf16.mxu0 %v1765_v12  ;;  %v1785_v32 = vld [vmem:[%s2009_s28] ss:$36 sps:$4 sm:$0xff]   ;;  %v1788_v34 = vld [vmem:[%s2009_s28 + $0x8] ss:$36 sps:$4 sm:$0xff]   ;;  %v1801_v45 = vld [vmem:[%s2009_s28 + $0x54] ss:$36 sps:$4 sm:$0xff]  }
  0x12   : > { %1578 = vmatprep.subr.bf16.mxu1 %v1766_v13  ;;  %v1787_v33 = vld [vmem:[%s2009_s28 + $0x4] ss:$36 sps:$4 sm:$0xff]   ;;  %v1790_v35 = vld [vmem:[%s2009_s28 + $0xc] ss:$36 sps:$4 sm:$0xff]   ;;  %v1809_v52 = vld [vmem:[%s2185_s1 + $0x158] sm:$0xff]  }
  0x13   : > { %1014 = vmatprep.mubr.bf16.mxu0 %v1787_v33  ;;  %1079 = vmatprep.mubr.bf16.mxu1 %v1790_v35  ;;  %v1795_v40 = vld [vmem:[%s2185_s1 + $0x148] sm:$0xff]   ;;  %v1804_v47 = vld [vmem:[%s2009_s28 + $0x50] ss:$36 sps:$4 sm:$0xff]   ;;  %v1810_v53 = vld [vmem:[%s2185_s1 + $0x1d8] sm:$0xff]  }
  0x14   : > { %1539 = vmatpush3.bf16.msra.mxu0 %v1767_v14  ;;  %v1796_v41 = vld [vmem:[%s2185_s1 + $0x1c8] sm:$0xff]   ;;  %v1805_v48 = vld [vmem:[%s2185_s1 + $0x150] sm:$0xff]   ;;  %v1811_v54 = vld [vmem:[%s2185_s1 + $0x118] sm:$0xff]  }
  0x15   : > { %1579 = vmatpush3.bf16.msra.mxu1 %v1768_v15  ;;  %1540 = vmatprep.subr.bf16.mxu0 %v1769_v16  ;;  %v1797_v42 = vld [vmem:[%s2185_s1 + $0x108] sm:$0xff]   ;;  %v1806_v49 = vld [vmem:[%s2185_s1 + $0x1d0] sm:$0xff]   ;;  %v1812_v55 = vld [vmem:[%s2185_s1 + $0x198] sm:$0xff]  }
  0x16   : > { %1580 = vmatprep.subr.bf16.mxu1 %v1770_v17  ;;  %v1798_v43 = vld [vmem:[%s2185_s1 + $0x188] sm:$0xff]   ;;  %v1807_v50 = vld [vmem:[%s2185_s1 + $0x110] sm:$0xff]   ;;  %v1815_v57 = vld [vmem:[%s2009_s28 + $0x9c] ss:$36 sps:$4 sm:$0xff]  }
  0x17   : > { %v1799_v44 = vld [vmem:[%s2009_s28 + $0x4c] ss:$36 sps:$4 sm:$0xff]   ;;  %v1813_v56 = vld [vmem:[%s2009_s28 + $0x94] ss:$36 sps:$4 sm:$0xff]   ;;  %v1819_v60 = vld [vmem:[%s2185_s1 + $0x160] sm:$0xff]  }
  0x18   : > { %1541 = vmatpush3.bf16.msra.mxu0 %v1771_v18  ;;  %v1803_v46 = vld [vmem:[%s2009_s28 + $0x48] ss:$36 sps:$4 sm:$0xff]   ;;  %v1808_v51 = vld [vmem:[%s2185_s1 + $0x190] sm:$0xff]   ;;  %v1818_v59 = vld [vmem:[%s2009_s28 + $0x98] ss:$36 sps:$4 sm:$0xff]  }
  0x19   : > { %1581 = vmatpush3.bf16.msra.mxu1 %v1772_v19  ;;  %1542 = vmatprep.subr.bf16.mxu0 %v1773_v20  ;;  %v1817_v58 = vld [vmem:[%s2009_s28 + $0x90] ss:$36 sps:$4 sm:$0xff]   ;;  %v1820_v61 = vld [vmem:[%s2185_s1 + $0x1e0] sm:$0xff]   ;;  %v1823_v0 = vld [vmem:[%s2185_s1 + $0x168] sm:$0xff]  }
  0x1a   : > { %1582 = vmatprep.subr.bf16.mxu1 %v1774_v21  ;;  %v1821_v62 = vld [vmem:[%s2185_s1 + $0x120] sm:$0xff]   ;;  %v1824_v1 = vld [vmem:[%s2185_s1 + $0x1e8] sm:$0xff]   ;;  %v1831_v6 = vld [vmem:[%s2009_s28 + $0xd8] ss:$36 sps:$4 sm:$0xff]  }
  0x1b   : > { %v1822_v63 = vld [vmem:[%s2185_s1 + $0x1a0] sm:$0xff]   ;;  %v1825_v2 = vld [vmem:[%s2185_s1 + $0x128] sm:$0xff]   ;;  %v1833_v8 = vld [vmem:[%s2185_s1 + $0x170] sm:$0xff]  }
  0x1c   : > { %1543 = vmatpush3.bf16.msra.mxu0 %v1775_v22  ;;  %v1826_v3 = vld [vmem:[%s2185_s1 + $0x1a8] sm:$0xff]   ;;  %v1827_v4 = vld [vmem:[%s2009_s28 + $0xdc] ss:$36 sps:$4 sm:$0xff]   ;;  %v1834_v9 = vld [vmem:[%s2185_s1 + $0x1f0] sm:$0xff]  }
  0x1d   : > { %1583 = vmatpush3.bf16.msra.mxu1 %v1776_v23  ;;  %1544 = vmatprep.subr.bf16.mxu0 %v1777_v24  ;;  %v1829_v5 = vld [vmem:[%s2009_s28 + $0xe4] ss:$36 sps:$4 sm:$0xff]   ;;  %v1835_v10 = vld [vmem:[%s2185_s1 + $0x130] sm:$0xff]   ;;  %v1837_v12 = vld [vmem:[%s2185_s1 + $0x178] sm:$0xff]  }
  0x1e   : > { %1584 = vmatprep.subr.bf16.mxu1 %v1778_v25  ;;  %v1832_v7 = vld [vmem:[%s2009_s28 + $0xe0] ss:$36 sps:$4 sm:$0xff]   ;;  %v1836_v11 = vld [vmem:[%s2185_s1 + $0x1b0] sm:$0xff]   ;;  %v1838_v13 = vld [vmem:[%s2185_s1 + $0x1f8] sm:$0xff]  }
  0x1f   : > { %v1839_v14 = vld [vmem:[%s2185_s1 + $0x138] sm:$0xff]   ;;  %v1841_v16 = vld [vmem:[%s2009_s28 + $0x10] ss:$36 sps:$4 sm:$0xff]   ;;  %v1847_v20 = vld [vmem:[%s2185_s1 + $0x200] sm:$0xff]  }
  0x20   : > { %1545 = vmatpush3.bf16.msra.mxu0 %v1779_v26  ;;  %v1840_v15 = vld [vmem:[%s2185_s1 + $0x1b8] sm:$0xff]   ;;  %v1848_v21 = vld [vmem:[%s2185_s1 + $0x208] sm:$0xff]   ;;  %v1854_v25 = vld [vmem:[%s2009_s28 + $0x60] ss:$36 sps:$4 sm:$0xff]  }
  0x21   : > { %1585 = vmatpush3.bf16.msra.mxu1 %v1780_v27  ;;  %1546 = vmatprep.subr.bf16.mxu0 %v1781_v28  ;;  %v1843_v17 = vld [vmem:[%s2009_s28 + $0x14] ss:$36 sps:$4 sm:$0xff]   ;;  %v1846_v19 = vld [vmem:[%s2009_s28 + $0x1c] ss:$36 sps:$4 sm:$0xff]   ;;  %v1851_v23 = vld [vmem:[%s2009_s28 + $0x64] ss:$36 sps:$4 sm:$0xff]  }
  0x22   : > { %1586 = vmatprep.subr.bf16.mxu1 %v1782_v29  ;;  %v1844_v18 = vld [vmem:[%s2009_s28 + $0x18] ss:$36 sps:$4 sm:$0xff]   ;;  %v1855_v26 = vld [vmem:[%s2185_s1 + $0x210] sm:$0xff]   ;;  %v1857_v27 = vld [vmem:[%s2009_s28 + $0xa4] ss:$36 sps:$4 sm:$0xff]  }
  0x23   : > { %v1849_v22 = vld [vmem:[%s2009_s28 + $0x5c] ss:$36 sps:$4 sm:$0xff]   ;;  %v1859_v28 = vld [vmem:[%s2009_s28 + $0xac] ss:$36 sps:$4 sm:$0xff]  }
  0x24   : > { %1547 = vmatpush3.bf16.msra.mxu0 %v1783_v30  ;;  %v1853_v24 = vld [vmem:[%s2009_s28 + $0x58] ss:$36 sps:$4 sm:$0xff]   ;;  %v1861_v30 = vld [vmem:[%s2009_s28 + $0xa0] ss:$36 sps:$4 sm:$0xff]   ;;  %v1865_v33 = vld [vmem:[%s2009_s28 + $0xec] ss:$36 sps:$4 sm:$0xff]  }
  0x25   : > { %1587 = vmatpush3.bf16.msra.mxu1 %v1784_v31  ;;  %1612 = vmatprep.subr.bf16.mxu0 %v1791_v36  ;;  %v1856_v29 = vld [vmem:[%s2185_s1 + $0x218] sm:$0xff]   ;;  %v1862_v31 = vld [vmem:[%s2009_s28 + $0xa8] ss:$36 sps:$4 sm:$0xff]  }
  0x26   : > { %1652 = vmatprep.subr.bf16.mxu1 %v1792_v37  ;;  %v1864_v35 = vld [vmem:[%s2185_s1 + $0x228] sm:$0xff]   ;;  %v1871_v37 = vld [vmem:[%s2185_s1 + $0x230] sm:$0xff]  }
  0x27   : > { %1015 = vmatmul.mubr.bf16.vlgmr.msra.gmra.mrb[0].mxu0 %v1785_v32  ;;  %v1863_v32 = vld [vmem:[%s2185_s1 + $0x220] sm:$0xff]   ;;  %v1869_v36 = vld [vmem:[%s2009_s28 + $0xe8] ss:$36 sps:$4 sm:$0xff]  }
  0x28   : > { %1080 = vmatmul.mubr.bf16.vlgmr.msra.gmra.mrb[0].mxu1 %v1788_v34  ;;  %1613 = vmatpush3.bf16.msra.mxu0 %v1793_v38  ;;  %v1867_v34 = vld [vmem:[%s2009_s28 + $0xf4] ss:$36 sps:$4 sm:$0xff]  }
  0x29   : > { %1653 = vmatpush3.bf16.msra.mxu1 %v1794_v39  ;;  %1614 = vmatprep.subr.bf16.mxu0 %v1795_v40  ;;  %v1870_v38 = vld [vmem:[%s2009_s28 + $0xf0] ss:$36 sps:$4 sm:$0xff]   ;;  %v1873_v39 = vld [vmem:[%s2009_s28 + $0x20] ss:$36 sps:$4 sm:$0xff]  }
  0x2a   : > { %1654 = vmatprep.subr.bf16.mxu1 %v1796_v41  ;;  %1022 = vmatprep.mubr.bf16.mxu0 %v1799_v44  ;;  %v1874_v40 = vld [vmem:[%s2009_s28 + $0xb0] ss:$36 sps:$4 sm:$0xff]   ;;  %v1872_v41 = vld [vmem:[%s2185_s1 + $0x238] sm:$0xff]  }
  0x2b   : > { %1087 = vmatprep.mubr.bf16.mxu1 %v1801_v45 }
  0x2c   : > { %1615 = vmatpush3.bf16.msra.mxu0 %v1797_v42  ;;  %v1875_v42 = vld [vmem:[%s2009_s28 + $0x68] ss:$36 sps:$4 sm:$0xff]  }
  0x2d   : > { %1655 = vmatpush3.bf16.msra.mxu1 %v1798_v43  ;;  %1616 = vmatprep.subr.bf16.mxu0 %v1805_v48  ;;  %v1876_v43 = vld [vmem:[%s2009_s28 + $0xf8] ss:$36 sps:$4 sm:$0xff]  }
  0x2e   : > { %1656 = vmatprep.subr.bf16.mxu1 %v1806_v49 }
  0x2f   : > { %1023 = vmatmul.mubr.bf16.gmra.mrb[4].mxu0 %v1803_v46 }
  0x30   : > { %1088 = vmatmul.mubr.bf16.gmra.mrb[4].mxu1 %v1804_v47  ;;  %1617 = vmatpush3.bf16.msra.mxu0 %v1807_v50 }
  0x31   : > { %1657 = vmatpush3.bf16.msra.mxu1 %v1808_v51  ;;  %1618 = vmatprep.subr.bf16.mxu0 %v1809_v52 }
  0x32   : > { %1658 = vmatprep.subr.bf16.mxu1 %v1810_v53  ;;  %1030 = vmatprep.mubr.bf16.mxu0 %v1813_v56 }
  0x33   : > { %1095 = vmatprep.mubr.bf16.mxu1 %v1815_v57 }
  0x34   : > { %1619 = vmatpush3.bf16.msra.mxu0 %v1811_v54 }
  0x35   : > { %1659 = vmatpush3.bf16.msra.mxu1 %v1812_v55  ;;  %1620 = vmatprep.subr.bf16.mxu0 %v1819_v60 }
  0x36   : > { %1660 = vmatprep.subr.bf16.mxu1 %v1820_v61 }
  0x37   : > { %1031 = vmatmul.mubr.bf16.gmra.mrb[8].mxu0 %v1817_v58 }
  0x38   : > { %1096 = vmatmul.mubr.bf16.gmra.mrb[8].mxu1 %v1818_v59  ;;  %1621 = vmatpush3.bf16.msra.mxu0 %v1821_v62 }
  0x39   : > { %1661 = vmatpush3.bf16.msra.mxu1 %v1822_v63  ;;  %1622 = vmatprep.subr.bf16.mxu0 %v1823_v0 }
  0x3a   : > { %1662 = vmatprep.subr.bf16.mxu1 %v1824_v1  ;;  %1038 = vmatprep.mubr.bf16.mxu0 %v1827_v4 }
  0x3b   : > { %1103 = vmatprep.mubr.bf16.mxu1 %v1829_v5 }
  0x3c   : > { %1623 = vmatpush3.bf16.msra.mxu0 %v1825_v2 }
  0x3d   : > { %1663 = vmatpush3.bf16.msra.mxu1 %v1826_v3  ;;  %1624 = vmatprep.subr.bf16.mxu0 %v1833_v8 }
  0x3e   : > { %1664 = vmatprep.subr.bf16.mxu1 %v1834_v9 }
  0x3f   : > { %1039 = vmatmul.mubr.bf16.gmra.mrb[12].mxu0 %v1831_v6 }
  0x40   : > { %1104 = vmatmul.mubr.bf16.gmra.mrb[12].mxu1 %v1832_v7  ;;  %1625 = vmatpush3.bf16.msra.mxu0 %v1835_v10 }
  0x41   : > { %1665 = vmatpush3.bf16.msra.mxu1 %v1836_v11  ;;  %1626 = vmatprep.subr.bf16.mxu0 %v1837_v12 }
  0x42   : > { %1666 = vmatprep.subr.bf16.mxu1 %v1838_v13  ;;  %1144 = vmatprep.mubr.bf16.mxu0 %v1843_v17 }
  0x43   : > { %1209 = vmatprep.mubr.bf16.mxu1 %v1846_v19 }
  0x44   : > { %1627 = vmatpush3.bf16.msra.mxu0 %v1839_v14 }
  0x45   : > { %1667 = vmatpush3.bf16.msra.mxu1 %v1840_v15  ;;  %1704 = vmatprep.subr.bf16.mxu0 %v1847_v20 }
  0x46   : > { %1728 = vmatprep.subr.bf16.mxu1 %v1847_v20 }
  0x47   : > { %1145 = vmatmul.mubr.bf16.vlgmr.msra.gmra.mrb[16].mxu0 %v1841_v16 }
  0x48   : > { %1210 = vmatmul.mubr.bf16.vlgmr.msra.gmra.mrb[16].mxu1 %v1844_v18  ;;  %1705 = vmatpush3.bf16.msra.mxu0 %v1847_v20 }
  0x49   : > { %1736 = vmatpush3.bf16.msra.mxu1 %v1847_v20  ;;  %1706 = vmatprep.subr.bf16.mxu0 %v1848_v21 }
  0x4a   : > { %1729 = vmatprep.subr.bf16.mxu1 %v1848_v21  ;;  %1152 = vmatprep.mubr.bf16.mxu0 %v1849_v22 }
  0x4b   : > { %1217 = vmatprep.mubr.bf16.mxu1 %v1851_v23 }
  0x4c   : > { %1707 = vmatpush3.bf16.msra.mxu0 %v1848_v21 }
  0x4d   : > { %1737 = vmatpush3.bf16.msra.mxu1 %v1848_v21  ;;  %1708 = vmatprep.subr.bf16.mxu0 %v1855_v26 }
  0x4e   : > { %1730 = vmatprep.subr.bf16.mxu1 %v1855_v26 }
  0x4f   : > { %1153 = vmatmul.mubr.bf16.gmra.mrb[20].mxu0 %v1853_v24 }
  0x50   : > { %1218 = vmatmul.mubr.bf16.gmra.mrb[20].mxu1 %v1854_v25  ;;  %1160 = vmatprep.mubr.bf16.mxu0 %v1857_v27 }
  0x51   : > { %1709 = vmatpush3.bf16.msra.mxu0 %v1855_v26  ;;  %1225 = vmatprep.mubr.bf16.mxu1 %v1859_v28 }
  0x52   : > { %1738 = vmatpush3.bf16.msra.mxu1 %v1855_v26  ;;  %1710 = vmatprep.subr.bf16.mxu0 %v1856_v29 }
  0x53   : > { %1731 = vmatprep.subr.bf16.mxu1 %v1856_v29 }
  0x55   : > { %1711 = vmatpush3.bf16.msra.mxu0 %v1856_v29 }
  0x56   : > { %1739 = vmatpush3.bf16.msra.mxu1 %v1856_v29  ;;  %1712 = vmatprep.subr.bf16.mxu0 %v1863_v32 }
  0x57   : > { %1161 = vmatmul.mubr.bf16.gmra.mrb[24].mxu0 %v1861_v30  ;;  %1732 = vmatprep.subr.bf16.mxu1 %v1863_v32 }
  0x58   : > { %1226 = vmatmul.mubr.bf16.gmra.mrb[24].mxu1 %v1862_v31  ;;  %1168 = vmatprep.mubr.bf16.mxu0 %v1865_v33 }
  0x59   : > { %1713 = vmatpush3.bf16.msra.mxu0 %v1863_v32  ;;  %1233 = vmatprep.mubr.bf16.mxu1 %v1867_v34 }
  0x5a   : > { %1740 = vmatpush3.bf16.msra.mxu1 %v1863_v32  ;;  %1714 = vmatprep.subr.bf16.mxu0 %v1864_v35 }
  0x5b   : > { %1733 = vmatprep.subr.bf16.mxu1 %v1864_v35 }
  0x5d   : > { %1715 = vmatpush3.bf16.msra.mxu0 %v1864_v35 }
  0x5e   : > { %1741 = vmatpush3.bf16.msra.mxu1 %v1864_v35  ;;  %1716 = vmatprep.subr.bf16.mxu0 %v1871_v37 }
  0x5f   : > { %1169 = vmatmul.mubr.bf16.gmra.mrb[28].mxu0 %v1869_v36  ;;  %1734 = vmatprep.subr.bf16.mxu1 %v1871_v37 }
  0x60   : > { %1234 = vmatmul.mubr.bf16.gmra.mrb[28].mxu1 %v1870_v38  ;;  %1720 = vmatprep.mubr.bf16.mxu0 %v1873_v39 }
  0x61   : > { %1717 = vmatpush3.bf16.msra.mxu0 %v1871_v37  ;;  %1724 = vmatprep.mubr.bf16.mxu1 %v1874_v40 }
  0x62   : > { %1742 = vmatpush3.bf16.msra.mxu1 %v1871_v37  ;;  %1718 = vmatprep.subr.bf16.mxu0 %v1872_v41 }
  0x63   : > { %1735 = vmatprep.subr.bf16.mxu1 %v1872_v41 }
  0x65   : > { %1719 = vmatpush3.bf16.msra.mxu0 %v1872_v41 }
  0x66   : > { %1743 = vmatpush3.bf16.msra.mxu1 %v1872_v41 }
  0x68   : > { %1721 = vmatmul.mubr.bf16.vlgmr.msra.gmra.mrb[32].mxu0 %v1875_v42 }
  0x69   : > { %1725 = vmatmul.mubr.bf16.vlgmr.msra.gmra.mrb[32].mxu1 %v1876_v43 }
  0xfa   : > { %v1548_v44 = vpop.f32.mrb[0].mxu0 }
  0xfb   : > { %v1588_v45 = vpop.f32.mrb[0].mxu1  ;;  %v1549_v46 = vpop.f32.mrb[1].mxu0 }
  0xfc   : > { %v1550_v47 = vadd.f32 %v1549_v46, %v1548_v44  ;;  %v1589_v48 = vpop.f32.mrb[1].mxu1  ;;  %v1551_v49 = vpop.f32.mrb[2].mxu0 }
  0xfd   : > { %v1590_v50 = vadd.f32 %v1589_v48, %v1588_v45  ;;  %v1591_v51 = vpop.f32.mrb[2].mxu1  ;;  %v1552_v52 = vpop.f32.mrb[3].mxu0 }
  0xfe   : > { %v1553_v53 = vadd.f32 %v1552_v52, %v1551_v49  ;;  %v1592_v54 = vpop.f32.mrb[3].mxu1 }
  0xff   : > { %v1082_v55 = vadd.f32 %v1590_v50, %v1550_v47  ;;  %v1593_v56 = vadd.f32 %v1592_v54, %v1591_v51 }
 0x101   : > { %v1085_v57 = vadd.f32 %v1593_v56, %v1553_v53 }
 0x102   : > { %v1554_v58 = vpop.f32.mrb[4].mxu0 }
 0x103   : > { %v1594_v59 = vpop.f32.mrb[4].mxu1  ;;  %v1555_v60 = vpop.f32.mrb[5].mxu0 }
 0x104   : > { %v1556_v61 = vadd.f32 %v1555_v60, %v1554_v58  ;;  %v1595_v62 = vpop.f32.mrb[5].mxu1  ;;  %v1557_v63 = vpop.f32.mrb[6].mxu0 }
 0x105   : > { %v1596_v0 = vadd.f32 %v1595_v62, %v1594_v59  ;;  %v1597_v1 = vpop.f32.mrb[6].mxu1  ;;  %v1558_v2 = vpop.f32.mrb[7].mxu0 }
 0x106   : > { %v1559_v3 = vadd.f32 %v1558_v2, %v1557_v63  ;;  %v1598_v4 = vpop.f32.mrb[7].mxu1 }
 0x107   : > { %v1090_v5 = vadd.f32 %v1596_v0, %v1556_v61  ;;  %v1599_v6 = vadd.f32 %v1598_v4, %v1597_v1 }
 0x109   : > { %v1093_v7 = vadd.f32 %v1599_v6, %v1559_v3 }
 0x10a   : > { %v1560_v8 = vpop.f32.mrb[8].mxu0 }
 0x10b   : > { %v1600_v9 = vpop.f32.mrb[8].mxu1  ;;  %v1561_v10 = vpop.f32.mrb[9].mxu0 }
 0x10c   : > { %v1562_v11 = vadd.f32 %v1561_v10, %v1560_v8  ;;  %v1601_v12 = vpop.f32.mrb[9].mxu1  ;;  %v1563_v13 = vpop.f32.mrb[10].mxu0 }
 0x10d   : > { %v1602_v14 = vadd.f32 %v1601_v12, %v1600_v9  ;;  %v1603_v15 = vpop.f32.mrb[10].mxu1  ;;  %v1564_v16 = vpop.f32.mrb[11].mxu0 }
 0x10e   : > { %v1565_v17 = vadd.f32 %v1564_v16, %v1563_v13  ;;  %v1604_v18 = vpop.f32.mrb[11].mxu1 }
 0x10f   : > { %v1098_v19 = vadd.f32 %v1602_v14, %v1562_v11  ;;  %v1605_v20 = vadd.f32 %v1604_v18, %v1603_v15 }
 0x111   : > { %v1101_v21 = vadd.f32 %v1605_v20, %v1565_v17 }
 0x112   : > { %v1566_v22 = vpop.f32.mrb[12].mxu0 }
 0x113   : > { %v1606_v23 = vpop.f32.mrb[12].mxu1  ;;  %v1567_v24 = vpop.f32.mrb[13].mxu0 }
 0x114   : > { %v1607_v25 = vpop.f32.mrb[13].mxu1  ;;  %v1568_v26 = vadd.f32 %v1567_v24, %v1566_v22  ;;  %v1569_v28 = vpop.f32.mrb[14].mxu0 }
 0x115   : > { %v1608_v27 = vadd.f32 %v1607_v25, %v1606_v23  ;;  %v1609_v29 = vpop.f32.mrb[14].mxu1  ;;  %v1570_v30 = vpop.f32.mrb[15].mxu0 }
 0x116   : > { %v1610_v31 = vpop.f32.mrb[15].mxu1  ;;  %v1571_v33 = vadd.f32 %v1570_v30, %v1569_v28 }
 0x117   : > { %v1106_v32 = vadd.f32 %v1608_v27, %v1568_v26  ;;  %v1611_v34 = vadd.f32 %v1610_v31, %v1609_v29 }
 0x119   : > { %v1109_v35 = vadd.f32 %v1611_v34, %v1571_v33 }
 0x11a   : > { %v1628_v36 = vpop.f32.mrb[16].mxu0 }
 0x11b   : > { %v1629_v37 = vpop.f32.mrb[17].mxu0  ;;  %v1668_v40 = vpop.f32.mrb[16].mxu1 }
 0x11c   : > { %v1630_v38 = vadd.f32 %v1629_v37, %v1628_v36  ;;  %v1631_v39 = vpop.f32.mrb[18].mxu0  ;;  %v1669_v42 = vpop.f32.mrb[17].mxu1 }
 0x11d   : > { %v1632_v41 = vpop.f32.mrb[19].mxu0  ;;  %v1670_v45 = vadd.f32 %v1669_v42, %v1668_v40  ;;  %v1671_v46 = vpop.f32.mrb[18].mxu1 }
 0x11e   : > { %v1147_v43 = vadd.f32 %v1630_v38, %v1082_v55  ;;  %v1633_v44 = vadd.f32 %v1632_v41, %v1631_v39  ;;  %v1672_v47 = vpop.f32.mrb[19].mxu1 }
 0x11f   : > { %v1673_v49 = vadd.f32 %v1672_v47, %v1671_v46 }
 0x120   : > { %v1150_v48 = vadd.f32 %v1633_v44, %v1085_v57  ;;  %v1212_v50 = vadd.f32 %v1670_v45, %v1147_v43 }
 0x122   : > { %v1634_v51 = vpop.f32.mrb[20].mxu0  ;;  %v1215_v52 = vadd.f32 %v1673_v49, %v1150_v48 }
 0x123   : > { %v1635_v53 = vpop.f32.mrb[21].mxu0  ;;  %v1674_v58 = vpop.f32.mrb[20].mxu1 }
 0x124   : > { %v1636_v54 = vadd.f32 %v1635_v53, %v1634_v51  ;;  %v1637_v56 = vpop.f32.mrb[22].mxu0  ;;  %v1675_v60 = vpop.f32.mrb[21].mxu1 }
 0x125   : > { %v1638_v59 = vpop.f32.mrb[23].mxu0  ;;  %v1676_v63 = vadd.f32 %v1675_v60, %v1674_v58  ;;  %v1677_v0 = vpop.f32.mrb[22].mxu1 }
 0x126   : > { %v1155_v61 = vadd.f32 %v1636_v54, %v1090_v5  ;;  %v1639_v62 = vadd.f32 %v1638_v59, %v1637_v56  ;;  %v1678_v55 = vpop.f32.mrb[23].mxu1 }
 0x127   : > { %v1679_v2 = vadd.f32 %v1678_v55, %v1677_v0 }
 0x128   : > { %v1158_v1 = vadd.f32 %v1639_v62, %v1093_v7  ;;  %v1220_v3 = vadd.f32 %v1676_v63, %v1155_v61 }
 0x12a   : > { %v1640_v4 = vpop.f32.mrb[24].mxu0  ;;  %v1223_v57 = vadd.f32 %v1679_v2, %v1158_v1 }
 0x12b   : > { %v1641_v6 = vpop.f32.mrb[25].mxu0  ;;  %v1680_v10 = vpop.f32.mrb[24].mxu1 }
 0x12c   : > { %v1642_v8 = vadd.f32 %v1641_v6, %v1640_v4  ;;  %v1643_v9 = vpop.f32.mrb[26].mxu0  ;;  %v1681_v12 = vpop.f32.mrb[25].mxu1 }
 0x12d   : > { %v1644_v11 = vpop.f32.mrb[27].mxu0  ;;  %v1682_v15 = vadd.f32 %v1681_v12, %v1680_v10  ;;  %v1683_v16 = vpop.f32.mrb[26].mxu1 }
 0x12e   : > { %v1163_v13 = vadd.f32 %v1642_v8, %v1098_v19  ;;  %v1645_v14 = vadd.f32 %v1644_v11, %v1643_v9  ;;  %v1684_v5 = vpop.f32.mrb[27].mxu1 }
 0x12f   : > { %v1685_v18 = vadd.f32 %v1684_v5, %v1683_v16 }
 0x130   : > { %v1166_v17 = vadd.f32 %v1645_v14, %v1101_v21  ;;  %v1228_v20 = vadd.f32 %v1682_v15, %v1163_v13 }
 0x132   : > { %v1646_v22 = vpop.f32.mrb[28].mxu0  ;;  %v1231_v7 = vadd.f32 %v1685_v18, %v1166_v17 }
 0x133   : > { %v1647_v23 = vpop.f32.mrb[29].mxu0  ;;  %v1686_v26 = vpop.f32.mrb[28].mxu1 }
 0x134   : > { %v1648_v24 = vadd.f32 %v1647_v23, %v1646_v22  ;;  %v1649_v25 = vpop.f32.mrb[30].mxu0  ;;  %v1687_v28 = vpop.f32.mrb[29].mxu1 }
 0x135   : > { %v1650_v27 = vpop.f32.mrb[31].mxu0  ;;  %v1688_v31 = vadd.f32 %v1687_v28, %v1686_v26  ;;  %v1689_v33 = vpop.f32.mrb[30].mxu1 }
 0x136   : > { %v1171_v29 = vadd.f32 %v1648_v24, %v1106_v32  ;;  %v1651_v30 = vadd.f32 %v1650_v27, %v1649_v25  ;;  %v1690_v19 = vpop.f32.mrb[31].mxu1 }
 0x137   : > { %v1691_v36 = vadd.f32 %v1690_v19, %v1689_v33 }
 0x138   : > { %v1174_v34 = vadd.f32 %v1651_v30, %v1109_v35  ;;  %v1236_v37 = vadd.f32 %v1688_v31, %v1171_v29 }
 0x13a   : > { %v1239_v38 = vadd.f32 %v1691_v36, %v1174_v34 }
 0x13b   : > { %v1722_v21 = vpop.f32.mrb[32].mxu0 }
 0x13c   : > { %v1285_v39 = vadd.f32 %v1722_v21, %v1220_v3  ;;  %v1726_v40 = vpop.f32.mrb[32].mxu1  ;;  %v1276_v41 = vpop.f32.mrb[33].mxu0 }
 0x13d   : > { %v1301_v42 = vadd.f32 %v1726_v40, %v1236_v37  ;;  %v1277_v43 = vadd.f32 %v1276_v41, %v1212_v50  ;;  %v1292_v44 = vpop.f32.mrb[33].mxu1  ;;  %v1723_v45 = vpop.f32.mrb[34].mxu0 }
 0x13e   : > { %v1293_v46 = vadd.f32 %v1292_v44, %v1228_v20  ;;  %v1288_v47 = vadd.f32 %v1723_v45, %v1223_v57  ;;  %v1727_v48 = vpop.f32.mrb[34].mxu1  ;;  %v1279_v32 = vpop.f32.mrb[35].mxu0  ;;  %v1323_v59 = vmul.f32 %v1285_v39, %v1285_v39 }
 0x13f   : > { %v1304_v49 = vadd.f32 %v1727_v48, %v1239_v38  ;;  %v1280_v51 = vadd.f32 %v1279_v32, %v1215_v52  ;;  %v1295_v53 = vpop.f32.mrb[35].mxu1  ;;  %v1321_v35 = vmul.f32 %v1277_v43, %v1277_v43  ;;  %v1327_v52 = vmul.f32 %v1301_v42, %v1301_v42 }
 0x140   : > { %v1296_v54 = vadd.f32 %v1295_v53, %v1231_v7  ;;  %v1324_v62 = vmul.f32 %v1288_v47, %v1288_v47  ;;  %v1325_v0 = vmul.f32 %v1293_v46, %v1293_v46 }
 0x141   : > { %v1307_v56 = vadd.f32 %v1280_v51, %v1277_v43  ;;  %v1322_v58 = vmul.f32 %v1280_v51, %v1280_v51  ;;  %v1328_v8 = vmul.f32 %v1304_v49, %v1304_v49 }
 0x142   : > { %v1326_v3 = vmul.f32 %v1296_v54, %v1296_v54 }
 0x143   : > { %v1308_v60 = vadd.f32 %v1307_v56, %v1285_v39  ;;  %v1329_v61 = vadd.f32 %v1322_v58, %v1321_v35 }
 0x145   : > { %v1330_v63 = vadd.f32 %v1329_v61, %v1323_v59  ;;  %v1309_v50 = vadd.f32 %v1308_v60, %v1288_v47 }
 0x147   : > { %v1310_v55 = vadd.f32 %v1309_v50, %v1293_v46  ;;  %v1331_v1 = vadd.f32 %v1330_v63, %v1324_v62 }
 0x149   : > { %v1311_v2 = vadd.f32 %v1310_v55, %v1296_v54  ;;  %v1332_v4 = vadd.f32 %v1331_v1, %v1325_v0 }
 0x14b   : > { %v1312_v57 = vadd.f32 %v1311_v2, %v1301_v42  ;;  %v1333_v6 = vadd.f32 %v1332_v4, %v1326_v3 }
 0x14d   : > { %v1313_v9 = vadd.f32 %v1312_v57, %v1304_v49  ;;  %v1334_v10 = vadd.f32 %v1333_v6, %v1327_v52 }
 0x14f   : > { %v1314_v11 = vrot.slane %v1313_v9, 4  ;;  %v1335_v12 = vadd.f32 %v1334_v10, %v1328_v8 }
 0x151   : > { %v1315_v13 = vadd.f32 %v1314_v11, %v1313_v9  ;;  %v1336_v14 = vrot.slane %v1335_v12, 4 }
 0x153   : > { %v1316_v15 = vrot.slane %v1315_v13, 2  ;;  %v1337_v16 = vadd.f32 %v1336_v14, %v1335_v12 }
 0x155   : > { %v1317_v5 = vadd.f32 %v1316_v15, %v1315_v13  ;;  %v1338_v17 = vrot.slane %v1337_v16, 2 }
 0x157   : > { %v1318_v18 = vrot.slane %v1317_v5, 1  ;;  %v1339_v20 = vadd.f32 %v1338_v17, %v1337_v16 }
 0x159   : > { %v1319_v22 = vadd.f32 %v1318_v18, %v1317_v5  ;;  %v1340_v7 = vrot.slane %v1339_v20, 1 }
 0x15b   : > { %1320 = vst [vmem:[%s177_s17] sm:$0x1] %v1319_v22  ;;  %v1341_v23 = vadd.f32 %v1340_v7, %v1339_v20 }
 0x15d   : > { %1342 = vst [vmem:[%s180_s21] sm:$0x1] %v1341_v23 }
 0x15e PF: > { %s14_s12 = sadd.s32 1, %s1883_s12  }
 0x15f   : > { %p11_p5 = scmp.ge.s32.totalorder %s14_s12, 4  }
 0x161   :  { %13 = sbr.rel (!%p11_p5) target bundleno = 1 (0x1), region = 70 }

// kernel: residual_block_forward.9
= control target key start
LH: loop header
LB: loop body
LE: loop exit
PB: predicated region body
PF: predicated region fallthrough
CT: control target
= control target key end

     0   :  { %s1987_s12 = smov 0   ;;  %s2314_s0 = inlined_call_operand.vmem [shape: bf16[128,1280], index: 0, kind: input, shape index: {}]   ;;  %s2315_s1 = inlined_call_operand.vmem [shape: bf16[1280,128], index: 1, kind: input, shape index: {}]   ;;  %s2316_s2 = inlined_call_operand.vmem [shape: f32[1,128], index: 2, kind: input, shape index: {}]   ;;  %s2317_s3 = inlined_call_operand.vmem [shape: f32[128,128], index: 3, kind: output, shape index: {}]  }
   0x1 LB: > { %s1462_s13 = sadd.s32 4294967295, %s1965_s12   ;;  %p1466_p0 = scmp.ge.s32.totalorder %s1965_s12, 1  ;;  %s1965_s12 = sphi %s1987_s12, %s13_s12  }
   0x2   : > { %p139_p1 = scmp.lt.s32.totalorder %s1965_s12, 3 }
   0x4   : > { %p140_p2 = pnand %p1466_p0, %p139_p1 }
   0x5   : > { %v1819_v0 = vld [vmem:[%s2315_s1 + $0x40] sm:$0xff] (!%p140_p2)   ;;  %v1823_v4 = vld [vmem:[%s2315_s1 + $0x48] sm:$0xff] (!%p140_p2)   ;;  %v1827_v8 = vld [vmem:[%s2315_s1 + $0x50] sm:$0xff] (!%p140_p2)   ;;  %s1467_s19 = sshll.u32 (!%p140_p2), %s1462_s13, 3 }
   0x6   : > { %143 = sbr.rel (%p140_p2) target bundleno = 335 (0x14f), region = 32  ;;  %v1820_v1 = vld [vmem:[%s2315_s1 + $0xc0] sm:$0xff] (!%p140_p2)   ;;  %1594 = vmatprep.subr.bf16.mxu0 (!%p140_p2), %v1819_v0  ;;  %v1824_v5 = vld [vmem:[%s2315_s1 + $0xc8] sm:$0xff] (!%p140_p2)   ;;  %v1828_v9 = vld [vmem:[%s2315_s1 + $0xd0] sm:$0xff] (!%p140_p2)   ;;  %p165_p3 = scmp.lt.s32.totalorder (!%p140_p2), %s1467_s19, 15 }
   0x7   : > { %v1821_v2 = vld [vmem:[%s2315_s1] sm:$0xff] (!%p140_p2)   ;;  %1634 = vmatprep.subr.bf16.mxu1 (!%p140_p2), %v1820_v1  ;;  %v1825_v6 = vld [vmem:[%s2315_s1 + $0x8] sm:$0xff] (!%p140_p2)   ;;  %v1829_v10 = vld [vmem:[%s2315_s1 + $0x10] sm:$0xff] (!%p140_p2)  }
   0x8   : > { %v1822_v3 = vld [vmem:[%s2315_s1 + $0x80] sm:$0xff] (!%p140_p2)   ;;  %1595 = vmatpush3.bf16.msra.mxu0 (!%p140_p2), %v1821_v2  ;;  %v1826_v7 = vld [vmem:[%s2315_s1 + $0x88] sm:$0xff] (!%p140_p2)   ;;  %v1830_v11 = vld [vmem:[%s2315_s1 + $0x90] sm:$0xff] (!%p140_p2)  }
   0x9   : > { %1635 = vmatpush3.bf16.msra.mxu1 (!%p140_p2), %v1822_v3  ;;  %1596 = vmatprep.subr.bf16.mxu0 (!%p140_p2), %v1823_v4  ;;  %v1831_v12 = vld [vmem:[%s2315_s1 + $0x58] sm:$0xff] (!%p140_p2)   ;;  %v1835_v16 = vld [vmem:[%s2315_s1 + $0x60] sm:$0xff] (!%p140_p2)   ;;  %v1839_v20 = vld [vmem:[%s2315_s1 + $0x68] sm:$0xff] (!%p140_p2)  }
   0xa   : > { %1636 = vmatprep.subr.bf16.mxu1 (!%p140_p2), %v1824_v5  ;;  %v1832_v13 = vld [vmem:[%s2315_s1 + $0xd8] sm:$0xff] (!%p140_p2)   ;;  %v1836_v17 = vld [vmem:[%s2315_s1 + $0xe0] sm:$0xff] (!%p140_p2)   ;;  %v1840_v21 = vld [vmem:[%s2315_s1 + $0xe8] sm:$0xff] (!%p140_p2)  }
   0xb   : > { %v1833_v14 = vld [vmem:[%s2315_s1 + $0x18] sm:$0xff] (!%p140_p2)   ;;  %v1837_v18 = vld [vmem:[%s2315_s1 + $0x20] sm:$0xff] (!%p140_p2)   ;;  %v1841_v22 = vld [vmem:[%s2315_s1 + $0x28] sm:$0xff] (!%p140_p2)  }
   0xc   : > { %1597 = vmatpush3.bf16.msra.mxu0 (!%p140_p2), %v1825_v6  ;;  %v1834_v15 = vld [vmem:[%s2315_s1 + $0x98] sm:$0xff] (!%p140_p2)   ;;  %v1838_v19 = vld [vmem:[%s2315_s1 + $0xa0] sm:$0xff] (!%p140_p2)   ;;  %v1842_v23 = vld [vmem:[%s2315_s1 + $0xa8] sm:$0xff] (!%p140_p2)  }
   0xd   : > { %1637 = vmatpush3.bf16.msra.mxu1 %v1826_v7  ;;  %1598 = vmatprep.subr.bf16.mxu0 %v1827_v8  ;;  %s2319_s19 = smov (!%p165_p3, %s1467_s19), 15  ;;  %v1843_v24 = vld [vmem:[%s2315_s1 + $0x70] sm:$0xff]   ;;  %v1847_v28 = vld [vmem:[%s2315_s1 + $0x78] sm:$0xff]   ;;  %v1857_v36 = vld [vmem:[%s2315_s1 + $0x140] sm:$0xff]  }
   0xe   : > { %1638 = vmatprep.subr.bf16.mxu1 %v1828_v9  ;;  %v1844_v25 = vld [vmem:[%s2315_s1 + $0xf0] sm:$0xff]   ;;  %s1810_s16 = smul.u32 40, %s2319_s19  ;;  %v1848_v29 = vld [vmem:[%s2315_s1 + $0xf8] sm:$0xff]   ;;  %v1858_v37 = vld [vmem:[%s2315_s1 + $0x1c0] sm:$0xff]  }
   0xf   : > { %v1845_v26 = vld [vmem:[%s2315_s1 + $0x30] sm:$0xff]   ;;  %v1849_v30 = vld [vmem:[%s2315_s1 + $0x38] sm:$0xff]   ;;  %v1859_v38 = vld [vmem:[%s2315_s1 + $0x100] sm:$0xff]  }
  0x10   : > { %1599 = vmatpush3.bf16.msra.mxu0 %v1829_v10  ;;  %v1846_v27 = vld [vmem:[%s2315_s1 + $0xb0] sm:$0xff]   ;;  %s2093_s13 = scalar_lea.vmem %s2314_s0, %s1810_s16  ;;  %v1850_v31 = vld [vmem:[%s2315_s1 + $0xb8] sm:$0xff]   ;;  %v1860_v39 = vld [vmem:[%s2315_s1 + $0x180] sm:$0xff]  }
  0x11   : > { %1639 = vmatpush3.bf16.msra.mxu1 %v1830_v11  ;;  %1600 = vmatprep.subr.bf16.mxu0 %v1831_v12  ;;  %v1851_v32 = vld [vmem:[%s2093_s13] ss:$40 sps:$4 sm:$0xff]   ;;  %v1853_v33 = vld [vmem:[%s2093_s13 + $0x4] ss:$40 sps:$4 sm:$0xff]   ;;  %v1865_v44 = vld [vmem:[%s2093_s13 + $0x54] ss:$40 sps:$4 sm:$0xff]  }
  0x12   : > { %1640 = vmatprep.subr.bf16.mxu1 %v1832_v13  ;;  %v1854_v34 = vld [vmem:[%s2093_s13 + $0x8] ss:$40 sps:$4 sm:$0xff]   ;;  %v1856_v35 = vld [vmem:[%s2093_s13 + $0xc] ss:$40 sps:$4 sm:$0xff]   ;;  %1097 = vmatprep.mubr.bf16.mxu0 %v1853_v33  ;;  %v1867_v45 = vld [vmem:[%s2093_s13 + $0x5c] ss:$40 sps:$4 sm:$0xff]  }
  0x13   : > { %1162 = vmatprep.mubr.bf16.mxu1 %v1856_v35  ;;  %v1861_v40 = vld [vmem:[%s2315_s1 + $0x148] sm:$0xff]   ;;  %v1869_v46 = vld [vmem:[%s2093_s13 + $0x50] ss:$40 sps:$4 sm:$0xff]   ;;  %v1885_v60 = vld [vmem:[%s2315_s1 + $0x160] sm:$0xff]  }
  0x14   : > { %1601 = vmatpush3.bf16.msra.mxu0 %v1833_v14  ;;  %v1862_v41 = vld [vmem:[%s2315_s1 + $0x1c8] sm:$0xff]   ;;  %v1870_v47 = vld [vmem:[%s2093_s13 + $0x58] ss:$40 sps:$4 sm:$0xff]   ;;  %v1871_v48 = vld [vmem:[%s2315_s1 + $0x150] sm:$0xff]  }
  0x15   : > { %1641 = vmatpush3.bf16.msra.mxu1 %v1834_v15  ;;  %1602 = vmatprep.subr.bf16.mxu0 %v1835_v16  ;;  %v1863_v42 = vld [vmem:[%s2315_s1 + $0x108] sm:$0xff]   ;;  %v1872_v49 = vld [vmem:[%s2315_s1 + $0x1d0] sm:$0xff]   ;;  %v1875_v52 = vld [vmem:[%s2315_s1 + $0x158] sm:$0xff]  }
  0x16   : > { %1642 = vmatprep.subr.bf16.mxu1 %v1836_v17  ;;  %v1864_v43 = vld [vmem:[%s2315_s1 + $0x188] sm:$0xff]   ;;  %v1873_v50 = vld [vmem:[%s2315_s1 + $0x110] sm:$0xff]   ;;  %v1876_v53 = vld [vmem:[%s2315_s1 + $0x1d8] sm:$0xff]  }
  0x17   : > { %v1874_v51 = vld [vmem:[%s2315_s1 + $0x190] sm:$0xff]   ;;  %v1877_v54 = vld [vmem:[%s2315_s1 + $0x118] sm:$0xff]   ;;  %v1879_v56 = vld [vmem:[%s2093_s13 + $0xa4] ss:$40 sps:$4 sm:$0xff]  }
  0x18   : > { %1603 = vmatpush3.bf16.msra.mxu0 %v1837_v18  ;;  %v1878_v55 = vld [vmem:[%s2315_s1 + $0x198] sm:$0xff]   ;;  %v1881_v57 = vld [vmem:[%s2093_s13 + $0xac] ss:$40 sps:$4 sm:$0xff]   ;;  %v1883_v58 = vld [vmem:[%s2093_s13 + $0xa0] ss:$40 sps:$4 sm:$0xff]  }
  0x19   : > { %1643 = vmatpush3.bf16.msra.mxu1 %v1838_v19  ;;  %1604 = vmatprep.subr.bf16.mxu0 %v1839_v20  ;;  %v1884_v59 = vld [vmem:[%s2093_s13 + $0xa8] ss:$40 sps:$4 sm:$0xff]   ;;  %v1886_v61 = vld [vmem:[%s2315_s1 + $0x1e0] sm:$0xff]   ;;  %v1893_v4 = vld [vmem:[%s2093_s13 + $0xf4] ss:$40 sps:$4 sm:$0xff]  }
  0x1a   : > { %1644 = vmatprep.subr.bf16.mxu1 %v1840_v21  ;;  %v1887_v62 = vld [vmem:[%s2315_s1 + $0x120] sm:$0xff]   ;;  %v1889_v0 = vld [vmem:[%s2315_s1 + $0x168] sm:$0xff]   ;;  %v1897_v6 = vld [vmem:[%s2093_s13 + $0xf0] ss:$40 sps:$4 sm:$0xff]  }
  0x1b   : > { %v1888_v63 = vld [vmem:[%s2315_s1 + $0x1a0] sm:$0xff]   ;;  %v1890_v1 = vld [vmem:[%s2315_s1 + $0x1e8] sm:$0xff]   ;;  %v1899_v8 = vld [vmem:[%s2315_s1 + $0x170] sm:$0xff]  }
  0x1c   : > { %1605 = vmatpush3.bf16.msra.mxu0 %v1841_v22  ;;  %v1891_v2 = vld [vmem:[%s2315_s1 + $0x128] sm:$0xff]   ;;  %v1895_v5 = vld [vmem:[%s2093_s13 + $0xfc] ss:$40 sps:$4 sm:$0xff]   ;;  %v1898_v7 = vld [vmem:[%s2093_s13 + $0xf8] ss:$40 sps:$4 sm:$0xff]  }
  0x1d   : > { %1645 = vmatpush3.bf16.msra.mxu1 %v1842_v23  ;;  %1606 = vmatprep.subr.bf16.mxu0 %v1843_v24  ;;  %v1892_v3 = vld [vmem:[%s2315_s1 + $0x1a8] sm:$0xff]   ;;  %v1900_v9 = vld [vmem:[%s2315_s1 + $0x1f0] sm:$0xff]   ;;  %v1903_v12 = vld [vmem:[%s2315_s1 + $0x178] sm:$0xff]  }
  0x1e   : > { %1646 = vmatprep.subr.bf16.mxu1 %v1844_v25  ;;  %v1901_v10 = vld [vmem:[%s2315_s1 + $0x130] sm:$0xff]   ;;  %v1904_v13 = vld [vmem:[%s2315_s1 + $0x1f8] sm:$0xff]   ;;  %v1913_v20 = vld [vmem:[%s2315_s1 + $0x240] sm:$0xff]  }
  0x1f   : > { %v1902_v11 = vld [vmem:[%s2315_s1 + $0x1b0] sm:$0xff]   ;;  %v1905_v14 = vld [vmem:[%s2315_s1 + $0x138] sm:$0xff]   ;;  %v1914_v21 = vld [vmem:[%s2315_s1 + $0x200] sm:$0xff]  }
  0x20   : > { %1607 = vmatpush3.bf16.msra.mxu0 %v1845_v26  ;;  %v1906_v15 = vld [vmem:[%s2315_s1 + $0x1b8] sm:$0xff]   ;;  %v1915_v22 = vld [vmem:[%s2315_s1 + $0x248] sm:$0xff]   ;;  %v1933_v35 = vld [vmem:[%s2315_s1 + $0x260] sm:$0xff]  }
  0x21   : > { %1647 = vmatpush3.bf16.msra.mxu1 %v1846_v27  ;;  %1608 = vmatprep.subr.bf16.mxu0 %v1847_v28  ;;  %v1907_v16 = vld [vmem:[%s2093_s13 + $0x10] ss:$40 sps:$4 sm:$0xff]   ;;  %v1909_v17 = vld [vmem:[%s2093_s13 + $0x14] ss:$40 sps:$4 sm:$0xff]   ;;  %v1916_v23 = vld [vmem:[%s2315_s1 + $0x208] sm:$0xff]  }
  0x22   : > { %1648 = vmatprep.subr.bf16.mxu1 %v1848_v29  ;;  %v1910_v18 = vld [vmem:[%s2093_s13 + $0x18] ss:$40 sps:$4 sm:$0xff]   ;;  %v1912_v19 = vld [vmem:[%s2093_s13 + $0x1c] ss:$40 sps:$4 sm:$0xff]   ;;  %v1919_v25 = vld [vmem:[%s2093_s13 + $0x6c] ss:$40 sps:$4 sm:$0xff]  }
  0x23   : > { %v1917_v24 = vld [vmem:[%s2093_s13 + $0x64] ss:$40 sps:$4 sm:$0xff]   ;;  %v1921_v26 = vld [vmem:[%s2093_s13 + $0x60] ss:$40 sps:$4 sm:$0xff]   ;;  %v1923_v28 = vld [vmem:[%s2315_s1 + $0x250] sm:$0xff]  }
  0x24   : > { %1609 = vmatpush3.bf16.msra.mxu0 %v1849_v30  ;;  %v1922_v27 = vld [vmem:[%s2093_s13 + $0x68] ss:$40 sps:$4 sm:$0xff]   ;;  %v1925_v30 = vld [vmem:[%s2315_s1 + $0x258] sm:$0xff]  }
  0x25   : > { %1649 = vmatpush3.bf16.msra.mxu1 %v1850_v31  ;;  %1674 = vmatprep.subr.bf16.mxu0 %v1857_v36  ;;  %v1924_v29 = vld [vmem:[%s2315_s1 + $0x210] sm:$0xff]   ;;  %v1926_v31 = vld [vmem:[%s2315_s1 + $0x218] sm:$0xff]  }
  0x26   : > { %1714 = vmatprep.subr.bf16.mxu1 %v1858_v37  ;;  %v1929_v33 = vld [vmem:[%s2093_s13 + $0xbc] ss:$40 sps:$4 sm:$0xff]   ;;  %v1932_v36 = vld [vmem:[%s2093_s13 + $0xb8] ss:$40 sps:$4 sm:$0xff]  }
  0x27   : > { %1098 = vmatmul.mubr.bf16.vlgmr.msra.gmra.mrb[0].mxu0 %v1851_v32  ;;  %v1927_v32 = vld [vmem:[%s2093_s13 + $0xb4] ss:$40 sps:$4 sm:$0xff]   ;;  %v1934_v37 = vld [vmem:[%s2315_s1 + $0x220] sm:$0xff]  }
  0x28   : > { %1163 = vmatmul.mubr.bf16.vlgmr.msra.gmra.mrb[0].mxu1 %v1854_v34  ;;  %1675 = vmatpush3.bf16.msra.mxu0 %v1859_v38  ;;  %v1931_v34 = vld [vmem:[%s2093_s13 + $0xb0] ss:$40 sps:$4 sm:$0xff]   ;;  %v1935_v38 = vld [vmem:[%s2315_s1 + $0x268] sm:$0xff]  }
  0x29   : > { %1715 = vmatpush3.bf16.msra.mxu1 %v1860_v39  ;;  %1676 = vmatprep.subr.bf16.mxu0 %v1861_v40  ;;  %v1937_v39 = vld [vmem:[%s2093_s13 + $0x104] ss:$40 sps:$4 sm:$0xff]  }
  0x2a   : > { %1716 = vmatprep.subr.bf16.mxu1 %v1862_v41  ;;  %1105 = vmatprep.mubr.bf16.mxu0 %v1865_v44  ;;  %v1939_v40 = vld [vmem:[%s2093_s13 + $0x10c] ss:$40 sps:$4 sm:$0xff]   ;;  %v1942_v44 = vld [vmem:[%s2093_s13 + $0x108] ss:$40 sps:$4 sm:$0xff]  }
  0x2b   : > { %1170 = vmatprep.mubr.bf16.mxu1 %v1867_v45  ;;  %v1936_v41 = vld [vmem:[%s2315_s1 + $0x228] sm:$0xff]   ;;  %v1944_v45 = vld [vmem:[%s2315_s1 + $0x230] sm:$0xff]  }
  0x2c   : > { %1677 = vmatpush3.bf16.msra.mxu0 %v1863_v42  ;;  %v1941_v42 = vld [vmem:[%s2093_s13 + $0x100] ss:$40 sps:$4 sm:$0xff]  }
  0x2d   : > { %1717 = vmatpush3.bf16.msra.mxu1 %v1864_v43  ;;  %1678 = vmatprep.subr.bf16.mxu0 %v1871_v48  ;;  %v1943_v43 = vld [vmem:[%s2315_s1 + $0x270] sm:$0xff]   ;;  %v1952_v48 = vld [vmem:[%s2093_s13 + $0xc4] ss:$40 sps:$4 sm:$0xff]  }
  0x2e   : > { %1718 = vmatprep.subr.bf16.mxu1 %v1872_v49  ;;  %v1946_v49 = vld [vmem:[%s2315_s1 + $0x238] sm:$0xff]  }
  0x2f   : > { %1106 = vmatmul.mubr.bf16.gmra.mrb[4].mxu0 %v1869_v46  ;;  %v1945_v46 = vld [vmem:[%s2315_s1 + $0x278] sm:$0xff]  }
  0x30   : > { %1171 = vmatmul.mubr.bf16.gmra.mrb[4].mxu1 %v1870_v47  ;;  %1679 = vmatpush3.bf16.msra.mxu0 %v1873_v50  ;;  %v1949_v47 = vld [vmem:[%s2093_s13 + $0x24] ss:$40 sps:$4 sm:$0xff]   ;;  %v1947_v50 = vld [vmem:[%s2093_s13 + $0x20] ss:$40 sps:$4 sm:$0xff]  }
  0x31   : > { %1719 = vmatpush3.bf16.msra.mxu1 %v1874_v51  ;;  %1680 = vmatprep.subr.bf16.mxu0 %v1875_v52  ;;  %v1950_v51 = vld [vmem:[%s2093_s13 + $0xc0] ss:$40 sps:$4 sm:$0xff]   ;;  %v1953_v52 = vld [vmem:[%s2093_s13 + $0x74] ss:$40 sps:$4 sm:$0xff]  }
  0x32   : > { %1720 = vmatprep.subr.bf16.mxu1 %v1876_v53  ;;  %1113 = vmatprep.mubr.bf16.mxu0 %v1879_v56  ;;  %v1955_v53 = vld [vmem:[%s2093_s13 + $0x114] ss:$40 sps:$4 sm:$0xff]  }
  0x33   : > { %1178 = vmatprep.mubr.bf16.mxu1 %v1881_v57 }
  0x34   : > { %1681 = vmatpush3.bf16.msra.mxu0 %v1877_v54  ;;  %v1957_v54 = vld [vmem:[%s2093_s13 + $0x70] ss:$40 sps:$4 sm:$0xff]  }
  0x35   : > { %1721 = vmatpush3.bf16.msra.mxu1 %v1878_v55  ;;  %1682 = vmatprep.subr.bf16.mxu0 %v1885_v60  ;;  %v1958_v55 = vld [vmem:[%s2093_s13 + $0x110] ss:$40 sps:$4 sm:$0xff]   ;;  %s1470_s13 = sshll.u32 %s2319_s19, 3 }
  0x36   : > { %1722 = vmatprep.subr.bf16.mxu1 %v1886_v61  ;;  %s2298_s9 = scalar_lea.vmem %s2317_s3, %s1470_s13 }
  0x37   : > { %1114 = vmatmul.mubr.bf16.gmra.mrb[8].mxu0 %v1883_v58  ;;  %v1471_v58 = vld [vmem:[%s2316_s2] ss:$0 sm:$0xff] }
  0x38   : > { %1179 = vmatmul.mubr.bf16.gmra.mrb[8].mxu1 %v1884_v59  ;;  %1683 = vmatpush3.bf16.msra.mxu0 %v1887_v62 }
  0x39   : > { %1723 = vmatpush3.bf16.msra.mxu1 %v1888_v63  ;;  %1684 = vmatprep.subr.bf16.mxu0 %v1889_v0 }
  0x3a   : > { %1724 = vmatprep.subr.bf16.mxu1 %v1890_v1  ;;  %1121 = vmatprep.mubr.bf16.mxu0 %v1893_v4 }
  0x3b   : > { %1186 = vmatprep.mubr.bf16.mxu1 %v1895_v5 }
  0x3c   : > { %1685 = vmatpush3.bf16.msra.mxu0 %v1891_v2 }
  0x3d   : > { %1725 = vmatpush3.bf16.msra.mxu1 %v1892_v3  ;;  %1686 = vmatprep.subr.bf16.mxu0 %v1899_v8 }
  0x3e   : > { %1726 = vmatprep.subr.bf16.mxu1 %v1900_v9 }
  0x3f   : > { %1122 = vmatmul.mubr.bf16.gmra.mrb[12].mxu0 %v1897_v6 }
  0x40   : > { %1187 = vmatmul.mubr.bf16.gmra.mrb[12].mxu1 %v1898_v7  ;;  %1687 = vmatpush3.bf16.msra.mxu0 %v1901_v10 }
  0x41   : > { %1727 = vmatpush3.bf16.msra.mxu1 %v1902_v11  ;;  %1688 = vmatprep.subr.bf16.mxu0 %v1903_v12 }
  0x42   : > { %1728 = vmatprep.subr.bf16.mxu1 %v1904_v13  ;;  %1227 = vmatprep.mubr.bf16.mxu0 %v1909_v17 }
  0x43   : > { %1292 = vmatprep.mubr.bf16.mxu1 %v1912_v19 }
  0x44   : > { %1689 = vmatpush3.bf16.msra.mxu0 %v1905_v14 }
  0x45   : > { %1729 = vmatpush3.bf16.msra.mxu1 %v1906_v15  ;;  %1754 = vmatprep.subr.bf16.mxu0 %v1913_v20 }
  0x46   : > { %1794 = vmatprep.subr.bf16.mxu1 %v1913_v20 }
  0x47   : > { %1228 = vmatmul.mubr.bf16.vlgmr.msra.gmra.mrb[16].mxu0 %v1907_v16 }
  0x48   : > { %1293 = vmatmul.mubr.bf16.vlgmr.msra.gmra.mrb[16].mxu1 %v1910_v18  ;;  %1755 = vmatpush3.bf16.msra.mxu0 %v1914_v21 }
  0x49   : > { %1802 = vmatpush3.bf16.msra.mxu1 %v1914_v21  ;;  %1756 = vmatprep.subr.bf16.mxu0 %v1915_v22 }
  0x4a   : > { %1795 = vmatprep.subr.bf16.mxu1 %v1915_v22  ;;  %1235 = vmatprep.mubr.bf16.mxu0 %v1917_v24 }
  0x4b   : > { %1300 = vmatprep.mubr.bf16.mxu1 %v1919_v25 }
  0x4c   : > { %1757 = vmatpush3.bf16.msra.mxu0 %v1916_v23 }
  0x4d   : > { %1803 = vmatpush3.bf16.msra.mxu1 %v1916_v23  ;;  %1758 = vmatprep.subr.bf16.mxu0 %v1923_v28 }
  0x4e   : > { %1796 = vmatprep.subr.bf16.mxu1 %v1923_v28 }
  0x4f   : > { %1236 = vmatmul.mubr.bf16.gmra.mrb[20].mxu0 %v1921_v26 }
  0x50   : > { %1301 = vmatmul.mubr.bf16.gmra.mrb[20].mxu1 %v1922_v27  ;;  %1759 = vmatpush3.bf16.msra.mxu0 %v1924_v29 }
  0x51   : > { %1804 = vmatpush3.bf16.msra.mxu1 %v1924_v29  ;;  %1760 = vmatprep.subr.bf16.mxu0 %v1925_v30 }
  0x52   : > { %1797 = vmatprep.subr.bf16.mxu1 %v1925_v30  ;;  %1243 = vmatprep.mubr.bf16.mxu0 %v1927_v32 }
  0x53   : > { %1308 = vmatprep.mubr.bf16.mxu1 %v1929_v33 }
  0x54   : > { %1761 = vmatpush3.bf16.msra.mxu0 %v1926_v31 }
  0x55   : > { %1805 = vmatpush3.bf16.msra.mxu1 %v1926_v31  ;;  %1762 = vmatprep.subr.bf16.mxu0 %v1933_v35 }
  0x56   : > { %1798 = vmatprep.subr.bf16.mxu1 %v1933_v35 }
  0x57   : > { %1244 = vmatmul.mubr.bf16.gmra.mrb[24].mxu0 %v1931_v34 }
  0x58   : > { %1309 = vmatmul.mubr.bf16.gmra.mrb[24].mxu1 %v1932_v36  ;;  %1763 = vmatpush3.bf16.msra.mxu0 %v1934_v37 }
  0x59   : > { %1251 = vmatprep.mubr.bf16.mxu0 %v1937_v39  ;;  %1806 = vmatpush3.bf16.msra.mxu1 %v1934_v37 }
  0x5a   : > { %1764 = vmatprep.subr.bf16.mxu0 %v1935_v38  ;;  %1799 = vmatprep.subr.bf16.mxu1 %v1935_v38 }
  0x5b   : > { %1316 = vmatprep.mubr.bf16.mxu1 %v1939_v40 }
  0x5c   : > { %1765 = vmatpush3.bf16.msra.mxu0 %v1936_v41 }
  0x5d   : > { %1807 = vmatpush3.bf16.msra.mxu1 %v1936_v41  ;;  %1766 = vmatprep.subr.bf16.mxu0 %v1943_v43 }
  0x5e   : > { %1800 = vmatprep.subr.bf16.mxu1 %v1943_v43 }
  0x5f   : > { %1252 = vmatmul.mubr.bf16.gmra.mrb[28].mxu0 %v1941_v42 }
  0x60   : > { %1317 = vmatmul.mubr.bf16.gmra.mrb[28].mxu1 %v1942_v44  ;;  %1357 = vmatprep.mubr.bf16.mxu0 %v1949_v47 }
  0x61   : > { %1767 = vmatpush3.bf16.msra.mxu0 %v1944_v45  ;;  %1373 = vmatprep.mubr.bf16.mxu1 %v1952_v48 }
  0x62   : > { %1808 = vmatpush3.bf16.msra.mxu1 %v1944_v45  ;;  %1768 = vmatprep.subr.bf16.mxu0 %v1945_v46 }
  0x63   : > { %1801 = vmatprep.subr.bf16.mxu1 %v1945_v46 }
  0x65   : > { %1769 = vmatpush3.bf16.msra.mxu0 %v1946_v49 }
  0x66   : > { %1809 = vmatpush3.bf16.msra.mxu1 %v1946_v49 }
  0x68   : > { %1358 = vmatmul.mubr.bf16.vlgmr.msra.gmra.mrb[32].mxu0 %v1947_v50 }
  0x69   : > { %1374 = vmatmul.mubr.bf16.vlgmr.msra.gmra.mrb[32].mxu1 %v1950_v51  ;;  %1365 = vmatprep.mubr.bf16.mxu0 %v1953_v52 }
  0x6a   : > { %1381 = vmatprep.mubr.bf16.mxu1 %v1955_v53 }
  0x70   : > { %1366 = vmatmul.mubr.bf16.gmra.mrb[36].mxu0 %v1957_v54 }
  0x71   : > { %1382 = vmatmul.mubr.bf16.gmra.mrb[36].mxu1 %v1958_v55 }
  0xfa   : > { %v1610_v56 = vpop.f32.mrb[0].mxu0 }
  0xfb   : > { %v1650_v57 = vpop.f32.mrb[0].mxu1  ;;  %v1611_v59 = vpop.f32.mrb[1].mxu0 }
  0xfc   : > { %v1612_v60 = vadd.f32 %v1611_v59, %v1610_v56  ;;  %v1651_v61 = vpop.f32.mrb[1].mxu1  ;;  %v1613_v62 = vpop.f32.mrb[2].mxu0 }
  0xfd   : > { %v1652_v63 = vadd.f32 %v1651_v61, %v1650_v57  ;;  %v1653_v0 = vpop.f32.mrb[2].mxu1  ;;  %v1614_v1 = vpop.f32.mrb[3].mxu0 }
  0xfe   : > { %v1100_v2 = vadd.f32 %v1612_v60, %v1471_v58  ;;  %v1615_v3 = vadd.f32 %v1614_v1, %v1613_v62  ;;  %v1654_v4 = vpop.f32.mrb[3].mxu1 }
  0xff   : > { %v1655_v5 = vadd.f32 %v1654_v4, %v1653_v0 }
 0x100   : > { %v1165_v6 = vadd.f32 %v1652_v63, %v1100_v2  ;;  %v1103_v7 = vadd.f32 %v1615_v3, %v1471_v58 }
 0x102   : > { %v1168_v8 = vadd.f32 %v1655_v5, %v1103_v7  ;;  %v1616_v9 = vpop.f32.mrb[4].mxu0 }
 0x103   : > { %v1656_v10 = vpop.f32.mrb[4].mxu1  ;;  %v1617_v11 = vpop.f32.mrb[5].mxu0 }
 0x104   : > { %v1618_v12 = vadd.f32 %v1617_v11, %v1616_v9  ;;  %v1657_v13 = vpop.f32.mrb[5].mxu1  ;;  %v1619_v14 = vpop.f32.mrb[6].mxu0 }
 0x105   : > { %v1658_v15 = vadd.f32 %v1657_v13, %v1656_v10  ;;  %v1659_v16 = vpop.f32.mrb[6].mxu1  ;;  %v1620_v17 = vpop.f32.mrb[7].mxu0 }
 0x106   : > { %v1108_v18 = vadd.f32 %v1618_v12, %v1471_v58  ;;  %v1621_v19 = vadd.f32 %v1620_v17, %v1619_v14  ;;  %v1660_v20 = vpop.f32.mrb[7].mxu1 }
 0x107   : > { %v1661_v21 = vadd.f32 %v1660_v20, %v1659_v16 }
 0x108   : > { %v1173_v22 = vadd.f32 %v1658_v15, %v1108_v18  ;;  %v1111_v23 = vadd.f32 %v1621_v19, %v1471_v58 }
 0x10a   : > { %v1176_v24 = vadd.f32 %v1661_v21, %v1111_v23  ;;  %v1622_v25 = vpop.f32.mrb[8].mxu0 }
 0x10b   : > { %v1662_v26 = vpop.f32.mrb[8].mxu1  ;;  %v1623_v27 = vpop.f32.mrb[9].mxu0 }
 0x10c   : > { %v1624_v28 = vadd.f32 %v1623_v27, %v1622_v25  ;;  %v1663_v29 = vpop.f32.mrb[9].mxu1  ;;  %v1625_v30 = vpop.f32.mrb[10].mxu0 }
 0x10d   : > { %v1664_v31 = vadd.f32 %v1663_v29, %v1662_v26  ;;  %v1665_v32 = vpop.f32.mrb[10].mxu1  ;;  %v1626_v33 = vpop.f32.mrb[11].mxu0 }
 0x10e   : > { %v1116_v34 = vadd.f32 %v1624_v28, %v1471_v58  ;;  %v1627_v35 = vadd.f32 %v1626_v33, %v1625_v30  ;;  %v1666_v36 = vpop.f32.mrb[11].mxu1 }
 0x10f   : > { %v1667_v37 = vadd.f32 %v1666_v36, %v1665_v32 }
 0x110   : > { %v1181_v38 = vadd.f32 %v1664_v31, %v1116_v34  ;;  %v1119_v39 = vadd.f32 %v1627_v35, %v1471_v58 }
 0x112   : > { %v1184_v40 = vadd.f32 %v1667_v37, %v1119_v39  ;;  %v1628_v41 = vpop.f32.mrb[12].mxu0 }
 0x113   : > { %v1668_v42 = vpop.f32.mrb[12].mxu1  ;;  %v1629_v43 = vpop.f32.mrb[13].mxu0 }
 0x114   : > { %v1669_v44 = vpop.f32.mrb[13].mxu1  ;;  %v1630_v45 = vadd.f32 %v1629_v43, %v1628_v41  ;;  %v1631_v47 = vpop.f32.mrb[14].mxu0 }
 0x115   : > { %v1670_v46 = vadd.f32 %v1669_v44, %v1668_v42  ;;  %v1671_v48 = vpop.f32.mrb[14].mxu1  ;;  %v1632_v49 = vpop.f32.mrb[15].mxu0 }
 0x116   : > { %v1672_v50 = vpop.f32.mrb[15].mxu1  ;;  %v1124_v51 = vadd.f32 %v1630_v45, %v1471_v58  ;;  %v1633_v52 = vadd.f32 %v1632_v49, %v1631_v47 }
 0x117   : > { %v1673_v53 = vadd.f32 %v1672_v50, %v1671_v48 }
 0x118   : > { %v1189_v54 = vadd.f32 %v1670_v46, %v1124_v51  ;;  %v1127_v55 = vadd.f32 %v1633_v52, %v1471_v58 }
 0x11a   : > { %v1192_v56 = vadd.f32 %v1673_v53, %v1127_v55  ;;  %v1690_v57 = vpop.f32.mrb[16].mxu0 }
 0x11b   : > { %v1691_v59 = vpop.f32.mrb[17].mxu0  ;;  %v1730_v60 = vpop.f32.mrb[16].mxu1 }
 0x11c   : > { %v1692_v61 = vadd.f32 %v1691_v59, %v1690_v57  ;;  %v1693_v62 = vpop.f32.mrb[18].mxu0  ;;  %v1731_v63 = vpop.f32.mrb[17].mxu1 }
 0x11d   : > { %v1694_v0 = vpop.f32.mrb[19].mxu0  ;;  %v1732_v2 = vadd.f32 %v1731_v63, %v1730_v60  ;;  %v1733_v3 = vpop.f32.mrb[18].mxu1 }
 0x11e   : > { %v1230_v1 = vadd.f32 %v1692_v61, %v1165_v6  ;;  %v1695_v4 = vadd.f32 %v1694_v0, %v1693_v62  ;;  %v1734_v5 = vpop.f32.mrb[19].mxu1 }
 0x11f   : > { %v1735_v10 = vadd.f32 %v1734_v5, %v1733_v3 }
 0x120   : > { %v1295_v7 = vadd.f32 %v1732_v2, %v1230_v1  ;;  %v1233_v9 = vadd.f32 %v1695_v4, %v1168_v8 }
 0x122   : > { %v2288_v11 = vadd.f32 %v1735_v10, %v1233_v9  ;;  %v1696_v12 = vpop.f32.mrb[20].mxu0 }
 0x123   : > { %v1697_v58 = vpop.f32.mrb[21].mxu0  ;;  %v1736_v13 = vpop.f32.mrb[20].mxu1 }
 0x124   : > { %v1698_v14 = vadd.f32 %v1697_v58, %v1696_v12  ;;  %v1699_v15 = vpop.f32.mrb[22].mxu0  ;;  %v1737_v16 = vpop.f32.mrb[21].mxu1 }
 0x125   : > { %v1700_v17 = vpop.f32.mrb[23].mxu0  ;;  %v1738_v19 = vadd.f32 %v1737_v16, %v1736_v13  ;;  %v1739_v20 = vpop.f32.mrb[22].mxu1 }
 0x126   : > { %v1238_v18 = vadd.f32 %v1698_v14, %v1173_v22  ;;  %v1701_v6 = vadd.f32 %v1700_v17, %v1699_v15  ;;  %v1740_v21 = vpop.f32.mrb[23].mxu1 }
 0x127   : > { %v1741_v26 = vadd.f32 %v1740_v21, %v1739_v20 }
 0x128   : > { %v2290_v23 = vadd.f32 %v1738_v19, %v1238_v18  ;;  %v1241_v25 = vadd.f32 %v1701_v6, %v1176_v24 }
 0x12a   : > { %v2292_v8 = vadd.f32 %v1741_v26, %v1241_v25  ;;  %v1702_v27 = vpop.f32.mrb[24].mxu0 }
 0x12b   : > { %v1703_v28 = vpop.f32.mrb[25].mxu0  ;;  %v1742_v29 = vpop.f32.mrb[24].mxu1 }
 0x12c   : > { %v1704_v30 = vadd.f32 %v1703_v28, %v1702_v27  ;;  %v1705_v31 = vpop.f32.mrb[26].mxu0  ;;  %v1743_v32 = vpop.f32.mrb[25].mxu1 }
 0x12d   : > { %v1706_v33 = vpop.f32.mrb[27].mxu0  ;;  %v1744_v35 = vadd.f32 %v1743_v32, %v1742_v29  ;;  %v1745_v22 = vpop.f32.mrb[26].mxu1 }
 0x12e   : > { %v1246_v34 = vadd.f32 %v1704_v30, %v1181_v38  ;;  %v1707_v36 = vadd.f32 %v1706_v33, %v1705_v31  ;;  %v1746_v37 = vpop.f32.mrb[27].mxu1 }
 0x12f   : > { %v1747_v42 = vadd.f32 %v1746_v37, %v1745_v22 }
 0x130   : > { %v1311_v39 = vadd.f32 %v1744_v35, %v1246_v34  ;;  %v1249_v41 = vadd.f32 %v1707_v36, %v1184_v40 }
 0x132   : > { %v1314_v43 = vadd.f32 %v1747_v42, %v1249_v41  ;;  %v1708_v24 = vpop.f32.mrb[28].mxu0 }
 0x133   : > { %v1709_v44 = vpop.f32.mrb[29].mxu0  ;;  %v1748_v45 = vpop.f32.mrb[28].mxu1 }
 0x134   : > { %v1710_v46 = vadd.f32 %v1709_v44, %v1708_v24  ;;  %v1711_v47 = vpop.f32.mrb[30].mxu0  ;;  %v1749_v48 = vpop.f32.mrb[29].mxu1 }
 0x135   : > { %v1712_v49 = vpop.f32.mrb[31].mxu0  ;;  %v1750_v51 = vadd.f32 %v1749_v48, %v1748_v45  ;;  %v1751_v52 = vpop.f32.mrb[30].mxu1 }
 0x136   : > { %v1254_v50 = vadd.f32 %v1710_v46, %v1189_v54  ;;  %v1713_v38 = vadd.f32 %v1712_v49, %v1711_v47  ;;  %v1752_v53 = vpop.f32.mrb[31].mxu1 }
 0x137   : > { %v1753_v59 = vadd.f32 %v1752_v53, %v1751_v52 }
 0x138   : > { %v1319_v55 = vadd.f32 %v1750_v51, %v1254_v50  ;;  %v1257_v57 = vadd.f32 %v1713_v38, %v1192_v56 }
 0x13a   : > { %v1322_v60 = vadd.f32 %v1753_v59, %v1257_v57 }
 0x13b   : > { %v1770_v40 = vpop.f32.mrb[32].mxu0 }
 0x13c   : > { %v1782_v61 = vpop.f32.mrb[32].mxu1  ;;  %v1771_v62 = vpop.f32.mrb[33].mxu0 }
 0x13d   : > { %v1772_v63 = vadd.f32 %v1771_v62, %v1770_v40  ;;  %v1783_v0 = vpop.f32.mrb[33].mxu1  ;;  %v1773_v1 = vpop.f32.mrb[34].mxu0 }
 0x13e   : > { %v1784_v2 = vadd.f32 %v1783_v0, %v1782_v61  ;;  %v1785_v3 = vpop.f32.mrb[34].mxu1  ;;  %v1774_v4 = vpop.f32.mrb[35].mxu0 }
 0x13f   : > { %v1360_v5 = vadd.f32 %v1772_v63, %v1295_v7  ;;  %v1775_v54 = vadd.f32 %v1774_v4, %v1773_v1  ;;  %v1786_v9 = vpop.f32.mrb[35].mxu1 }
 0x140   : > { %v1376_v56 = vadd.f32 %v1784_v2, %v1311_v39  ;;  %v1787_v10 = vadd.f32 %v1786_v9, %v1785_v3 }
 0x141   : > { %v1390_v12 = vmax.f32 %v1360_v5, 0.0  ;;  %v1363_v58 = vadd.f32 %v1775_v54, %v2288_v11 }
 0x142   : > { %v1394_v13 = vmax.f32 %v1376_v56, 0.0  ;;  %v1379_v14 = vadd.f32 %v1787_v10, %v1314_v43 }
 0x143   : > { %1398 = vst [vmem:[%s2298_s9] sm:$0xff] %v1390_v12  ;;  %v1391_v7 = vmax.f32 %v1363_v58, 0.0  ;;  %v1776_v15 = vpop.f32.mrb[36].mxu0 }
 0x144   : > { %1402 = vst [vmem:[%s2298_s9 + $0x20] sm:$0xff] %v1394_v13  ;;  %v1395_v16 = vmax.f32 %v1379_v14, 0.0  ;;  %v1788_v17 = vpop.f32.mrb[36].mxu1  ;;  %v1777_v18 = vpop.f32.mrb[37].mxu0 }
 0x145   : > { %1399 = vst [vmem:[%s2298_s9 + $0x8] sm:$0xff] %v1391_v7  ;;  %v1778_v19 = vadd.f32 %v1777_v18, %v1776_v15  ;;  %v1789_v20 = vpop.f32.mrb[37].mxu1  ;;  %v1779_v6 = vpop.f32.mrb[38].mxu0 }
 0x146   : > { %1403 = vst [vmem:[%s2298_s9 + $0x28] sm:$0xff] %v1395_v16  ;;  %v1790_v21 = vadd.f32 %v1789_v20, %v1788_v17  ;;  %v1791_v25 = vpop.f32.mrb[38].mxu1  ;;  %v1780_v11 = vpop.f32.mrb[39].mxu0 }
 0x147   : > { %v1368_v26 = vadd.f32 %v1778_v19, %v2290_v23  ;;  %v1781_v27 = vadd.f32 %v1780_v11, %v1779_v6  ;;  %v1792_v28 = vpop.f32.mrb[39].mxu1 }
 0x148   : > { %v1384_v29 = vadd.f32 %v1790_v21, %v1319_v55  ;;  %v1793_v30 = vadd.f32 %v1792_v28, %v1791_v25 }
 0x149   : > { %v1392_v31 = vmax.f32 %v1368_v26, 0.0  ;;  %v1371_v32 = vadd.f32 %v1781_v27, %v2292_v8 }
 0x14a   : > { %v1396_v33 = vmax.f32 %v1384_v29, 0.0  ;;  %v1387_v34 = vadd.f32 %v1793_v30, %v1322_v60 }
 0x14b   : > { %1400 = vst [vmem:[%s2298_s9 + $0x10] sm:$0xff] %v1392_v31  ;;  %v1393_v35 = vmax.f32 %v1371_v32, 0.0 }
 0x14c   : > { %1404 = vst [vmem:[%s2298_s9 + $0x30] sm:$0xff] %v1396_v33  ;;  %v1397_v22 = vmax.f32 %v1387_v34, 0.0 }
 0x14d   : > { %1401 = vst [vmem:[%s2298_s9 + $0x18] sm:$0xff] %v1393_v35 }
 0x14e   : > { %1405 = vst [vmem:[%s2298_s9 + $0x38] sm:$0xff] %v1397_v22 }
 0x14f PF: > { %s13_s12 = sadd.s32 1, %s1965_s12  }
 0x150   : > { %p10_p4 = scmp.ge.s32.totalorder %s13_s12, 4  }
 0x152   :  { %12 = sbr.rel (!%p10_p4) target bundleno = 1 (0x1), region = 62 }

</bundles_post_ra>
